<compile_context>
chip_gen: v7x
topology: tpu7x:2x2x1
jax: 0.10.0
libtpu: 0.0.40
codegen_flags: <defaults>
</compile_context>

<pallas_src>
import jax
import jax.numpy as jnp
from jax import lax
import numpy as np
from jax.experimental import pallas as pl
from jax.experimental.pallas import tpu as pltpu


USE_BF16_MXU = False  # v6e/v7x: bf16 MXU operands (f32 accumulate); needs ~2e-2 tolerance.


# ---------------------------------------------------------------------------
# Fused Pallas kernel (one grid step == one batch element)
# ---------------------------------------------------------------------------
def _make_downblock_kernel(ho, wo, cin, inter, outc_pad):
    C = wo + 2                    # flat width of the extended coordinate system
    Me = ho * C                   # extended output rows (cols wo, wo+1 are garbage)
    Mq = ((Me + 2 * C + 2 + 7) // 8) * 8   # scratch rows (conv2 reads up to Me-1 + 2*C+2)

    def kernel(xpk_ref, w1_ref, t1_ref, w2_ref, t2_ref, wsk_ref, bsk_ref,
               o_ref, y1p_ref):
        # xpk_ref: (1, R*C, 4*cin)  parity phases, spatially flattened (width C),
        #                           packed along lanes: [.., p*cin + c] = phase p, chan c
        # w1_ref : (4, 4*cin, inter)    conv1 weights grouped by (dh,dw) offset, BN1 folded
        # t1_ref : (1, inter)           conv1 folded shift
        # w2_ref : (9, inter, outc_pad) conv2 per-tap weights, BN2 folded, Cout zero-padded
        # t2_ref : (1, outc_pad)        conv2 folded shift
        # wsk_ref: (4, 4*cin, outc_pad) 1x1 skip weights * 0.25, grouped by pool offset
        # bsk_ref: (1, outc_pad)        1x1 skip bias
        # o_ref  : (1, Me, outc_pad)    extended-coordinate output rows (lane-dense store)
        # y1p_ref: (Mq, inter)          flat, zero-bordered conv1 output (VMEM scratch)

        # ---- conv1 (3x3, stride 2, pad 1) + folded BN1, fused with avgpool+1x1 skip ----
        # One matmul per 2x2 spatial offset; K = 4*cin covers all 4 phases at once.
        acc1 = jnp.zeros((Me, inter), jnp.float32)
        accs = jnp.zeros((Me, outc_pad), jnp.float32)
        for q, off in enumerate((0, 1, C, C + 1)):
            s = xpk_ref[0, off:off + Me, :]                    # (Me, 4*cin) contiguous slice
            acc1 = acc1 + jnp.dot(s, w1_ref[q], preferred_element_type=jnp.float32)
            accs = accs + jnp.dot(s, wsk_ref[q], preferred_element_type=jnp.float32)
        y1 = jnp.maximum(acc1 + t1_ref[...], 0.0)              # (Me, inter)

        # zero the 2 garbage columns (extended cols wo, wo+1) so they become conv2's
        # left/right zero padding once staged into the flat scratch.
        col = lax.broadcasted_iota(jnp.int32, (Me, 1), 0) % C
        y1 = jnp.where(col < wo, y1, 0.0)

        # ---- stage y1 in VMEM: zero only the border rows, interior fully overwritten ----
        y1p_ref[0:C + 1, :] = jnp.zeros((C + 1, inter), y1p_ref.dtype)
        y1p_ref[C + 1 + Me:Mq, :] = jnp.zeros((Mq - (C + 1 + Me), inter), y1p_ref.dtype)
        y1p_ref[C + 1:C + 1 + Me, :] = y1.astype(y1p_ref.dtype)

        # ---- conv2 (3x3, stride 1, pad 1) + folded BN2 + ReLU: 9 contiguous slices ----
        acc2 = jnp.zeros((Me, outc_pad), jnp.float32)
        for kh in range(3):
            for kw in range(3):
                tap = y1p_ref[kh * C + kw:kh * C + kw + Me, :]  # (Me, inter) contiguous
                acc2 = acc2 + jnp.dot(tap, w2_ref[kh * 3 + kw],
                                      preferred_element_type=jnp.float32)
        y2 = jnp.maximum(acc2 + t2_ref[...], 0.0)

        # ---- residual add; lane-dense 128-wide store, one contiguous write DMA ----
        o_ref[0] = (y2 + accs + bsk_ref[...]).astype(o_ref.dtype)

    return kernel, Me, Mq


# ---------------------------------------------------------------------------
# Host-side folding / packing helpers (cheap, one-time per call)
# ---------------------------------------------------------------------------
def _fold_bn(gamma, beta, mean, var, conv_bias, eps=1e-5):
    """Inference-mode BN folded into (scale, shift) around the conv output."""
    scale = gamma / jnp.sqrt(var + eps)
    shift = beta + scale * (conv_bias - mean)
    return scale, shift


def _build_conv1_and_skip_weights(w1_oihw, s1, w1x1, cin, inter, outc, outc_pad):
    # conv1: group the 9 taps by their 2x2 phase-space offset q = 2*dh + dw;
    # tap (kh, kw) lives in the lane block of phase p = 2*(kh%2) + (kw%2).
    w1 = jnp.transpose(w1_oihw, (2, 3, 1, 0)) * s1            # (3,3,cin,inter), BN1 scale folded
    w1g = jnp.zeros((4, 4 * cin, inter), jnp.float32)
    for kh in range(3):
        for kw in range(3):
            q = 2 * (kh // 2) + (kw // 2)
            p = 2 * (kh % 2) + (kw % 2)
            w1g = w1g.at[q, p * cin:(p + 1) * cin, :].set(w1[kh, kw])
    # skip: the avg-pool tap at offset q reads phase (3 - q); 1/4 pool factor folded in.
    wsk = jnp.transpose(w1x1[:, :, 0, 0]) * 0.25               # (cin, outc)
    wskg = jnp.zeros((4, 4 * cin, outc_pad), jnp.float32)
    for q in range(4):
        p = 3 - q
        wskg = wskg.at[q, p * cin:(p + 1) * cin, :outc].set(wsk)
    return w1g, wskg


def _build_conv2_weights(w2_oihw, s2, inter, outc, outc_pad):
    w2 = jnp.transpose(w2_oihw, (2, 3, 1, 0)) * s2             # (3,3,inter,outc)
    w2 = w2.reshape(9, inter, outc)
    return jnp.pad(w2, ((0, 0), (0, 0), (0, outc_pad - outc)))


# ---------------------------------------------------------------------------
# DownBlock forward (Pallas-backed)
# ---------------------------------------------------------------------------
def downblock_forward(x_nchw, p, use_bf16=USE_BF16_MXU):
    x = jnp.transpose(x_nchw, (0, 2, 3, 1)).astype(jnp.float32)   # NHWC
    n, h, w, cin = x.shape
    assert h % 2 == 0 and w % 2 == 0, "DownBlock assumes even spatial dims"
    ho, wo = h // 2, w // 2
    inter = p["w1"].shape[0]
    outc = p["w2"].shape[0]
    outc_pad = ((outc + 127) // 128) * 128    # lane-dense output store

    # Pack the input once: pad, split into 4 (row,col) parity phases, pad each phase to
    # (ho+2, wo+2), flatten its spatial grid, and pack the phases along the lane dim.
    # This is a single ~1x-bytes permutation (XLA fuses transpose+pad+gather into one
    # HBM pass); a full EB-UNet would keep activations in this layout between blocks.
    R, C = ho + 2, wo + 2
    xp = jnp.pad(x, ((0, 0), (1, 1), (1, 1), (0, 0)))             # (n, h+2, w+2, cin)
    phases = [xp[:, a::2, b::2, :] for a in (0, 1) for b in (0, 1)]   # (n, ho+1, wo+1, cin)
    phases = [jnp.pad(ph, ((0, 0), (0, R - (ho + 1)), (0, C - (wo + 1)), (0, 0)))
              for ph in phases]
    xpk = jnp.concatenate(phases, axis=-1).reshape(n, R * C, 4 * cin)

    # Fold BN into weights/shifts, group conv1/skip taps, pad Cout to 128.
    s1, t1 = _fold_bn(p["g1"], p["be1"], p["m1"], p["v1"], p["b1"])
    s2, t2 = _fold_bn(p["g2"], p["be2"], p["m2"], p["v2"], p["b2"])
    w1g, wskg = _build_conv1_and_skip_weights(p["w1"], s1, p["w1x1"],
                                              cin, inter, outc, outc_pad)
    w2t = _build_conv2_weights(p["w2"], s2, inter, outc, outc_pad)
    t1 = t1.reshape(1, inter)
    t2p = jnp.zeros((1, outc_pad), jnp.float32).at[0, :outc].set(t2)
    bskp = jnp.zeros((1, outc_pad), jnp.float32).at[0, :outc].set(p["b1x1"])

    op_dtype = jnp.bfloat16 if use_bf16 else jnp.float32
    xpk = xpk.astype(op_dtype)
    w1g = w1g.astype(op_dtype)
    wskg = wskg.astype(op_dtype)
    w2t = w2t.astype(op_dtype)

    kernel, Me, Mq = _make_downblock_kernel(ho, wo, cin, inter, outc_pad)

    out = pl.pallas_call(
        kernel,
        out_shape=jax.ShapeDtypeStruct((n, Me, outc_pad), jnp.float32),
        grid=(n,),
        in_specs=[
            pl.BlockSpec((1, R * C, 4 * cin), lambda b: (b, 0, 0)),
            pl.BlockSpec((4, 4 * cin, inter), lambda b: (0, 0, 0)),
            pl.BlockSpec((1, inter), lambda b: (0, 0)),
            pl.BlockSpec((9, inter, outc_pad), lambda b: (0, 0, 0)),
            pl.BlockSpec((1, outc_pad), lambda b: (0, 0)),
            pl.BlockSpec((4, 4 * cin, outc_pad), lambda b: (0, 0, 0)),
            pl.BlockSpec((1, outc_pad), lambda b: (0, 0)),
        ],
        out_specs=pl.BlockSpec((1, Me, outc_pad), lambda b: (b, 0, 0)),
        scratch_shapes=[pltpu.VMEM((Mq, inter), op_dtype)],
        compiler_params=pltpu.CompilerParams(
            dimension_semantics=("parallel",)),       # v7x: 2 TCs split the batch
    )(xpk, w1g, t1, w2t, t2p, wskg, bskp)

    # Strip the 2 garbage columns and the padded channels, back to NCHW.
    out = out.reshape(n, ho, C, outc_pad)[:, :, :wo, :outc]
    return jnp.transpose(out, (0, 3, 1, 2))


# ---------------------------------------------------------------------------
# Pure-JAX reference (for correctness check)
# ---------------------------------------------------------------------------
def downblock_reference(x, p, eps=1e-5):
    dn = ("NCHW", "OIHW", "NCHW")

    def bn(z, g, b, m, v):
        g = g[None, :, None, None]; b = b[None, :, None, None]
        m = m[None, :, None, None]; v = v[None, :, None, None]
        return (z - m) / jnp.sqrt(v + eps) * g + b

    z = lax.conv_general_dilated(x, p["w1"], (2, 2), ((1, 1), (1, 1)),
                                 dimension_numbers=dn) + p["b1"][None, :, None, None]
    z = jnp.maximum(bn(z, p["g1"], p["be1"], p["m1"], p["v1"]), 0.0)
    z = lax.conv_general_dilated(z, p["w2"], (1, 1), ((1, 1), (1, 1)),
                                 dimension_numbers=dn) + p["b2"][None, :, None, None]
    z = jnp.maximum(bn(z, p["g2"], p["be2"], p["m2"], p["v2"]), 0.0)

    n, c, h, w = x.shape
    pooled = x.reshape(n, c, h // 2, 2, w // 2, 2).mean(axis=(3, 5))
    skip = lax.conv_general_dilated(pooled, p["w1x1"], (1, 1), ((0, 0), (0, 0)),
                                    dimension_numbers=dn) + p["b1x1"][None, :, None, None]
    return z + skip


# ---------------------------------------------------------------------------
def make_params(key, cin, inter, cout):
    ks = jax.random.split(key, 16)
    u = lambda k, s, lo, hi: jax.random.uniform(k, s, jnp.float32, lo, hi)
    return {
        "w1": u(ks[0], (inter, cin, 3, 3), -0.3, 0.3),
        "b1": u(ks[1], (inter,), -0.1, 0.1),
        "g1": u(ks[2], (inter,), 0.8, 1.2),
        "be1": u(ks[3], (inter,), -0.1, 0.1),
        "m1": u(ks[4], (inter,), -0.2, 0.2),
        "v1": u(ks[5], (inter,), 0.5, 1.5),
        "w2": u(ks[6], (cout, inter, 3, 3), -0.3, 0.3),
        "b2": u(ks[7], (cout,), -0.1, 0.1),
        "g2": u(ks[8], (cout,), 0.8, 1.2),
        "be2": u(ks[9], (cout,), -0.1, 0.1),
        "m2": u(ks[10], (cout,), -0.2, 0.2),
        "v2": u(ks[11], (cout,), 0.5, 1.5),
        "w1x1": u(ks[12], (cout, cin, 1, 1), -0.5, 0.5),
        "b1x1": u(ks[13], (cout,), -0.1, 0.1),
    }


if __name__ == "__main__":
    key = jax.random.PRNGKey(0)
    k_x, k_p = jax.random.split(key)

    # DownBlock(input=4, output=8)  (inter defaults to output)
    CIN, INTER, COUT = 4, 8, 8
    x = jax.random.normal(k_x, (2, CIN, 16, 16), jnp.float32)   # NCHW, like PyTorch
    params = make_params(k_p, CIN, INTER, COUT)

    fwd = jax.jit(downblock_forward)
    out = jax.block_until_ready(fwd(x, params))

    ref = jax.block_until_ready(downblock_reference(x, params))
    assert out.shape == (2, COUT, 8, 8), out.shape
    tol = 2e-2 if USE_BF16_MXU else 1e-4
    np.testing.assert_allclose(np.asarray(out), np.asarray(ref), rtol=tol, atol=tol)

    print("KERNEL_OK")
</pallas_src>

<mosaic_0001>
module attributes {stable_mosaic.version = 11 : i64} {
  func.func @kernel(%arg0: i32, %arg1: memref<1x100x16xf32, #tpu.memory_space<vmem>>, %arg2: memref<4x16x8xf32, #tpu.memory_space<vmem>>, %arg3: memref<1x8xf32, #tpu.memory_space<vmem>>, %arg4: memref<9x8x128xf32, #tpu.memory_space<vmem>>, %arg5: memref<1x128xf32, #tpu.memory_space<vmem>>, %arg6: memref<4x16x128xf32, #tpu.memory_space<vmem>>, %arg7: memref<1x128xf32, #tpu.memory_space<vmem>>, %arg8: memref<1x80x128xf32, #tpu.memory_space<vmem>>, %arg9: memref<104x8xf32, #tpu.memory_space<vmem>>) attributes {dimension_semantics = [#tpu.dimension_semantics<parallel>], iteration_bounds = array<i64: 2>, scalar_prefetch = 0 : i64, scratch_operands = 1 : i64, tpu.core_type = #tpu.core_type<tc>, window_params = [{transform_indices = @transform_0, window_bounds = array<i64: 1, 100, 16>}, {pipeline_mode = #tpu.pipeline_mode<synchronous>, transform_indices = @transform_1, window_bounds = array<i64: 4, 16, 8>}, {pipeline_mode = #tpu.pipeline_mode<synchronous>, transform_indices = @transform_2, window_bounds = array<i64: 1, 8>}, {pipeline_mode = #tpu.pipeline_mode<synchronous>, transform_indices = @transform_3, window_bounds = array<i64: 9, 8, 128>}, {pipeline_mode = #tpu.pipeline_mode<synchronous>, transform_indices = @transform_4, window_bounds = array<i64: 1, 128>}, {pipeline_mode = #tpu.pipeline_mode<synchronous>, transform_indices = @transform_5, window_bounds = array<i64: 4, 16, 128>}, {pipeline_mode = #tpu.pipeline_mode<synchronous>, transform_indices = @transform_6, window_bounds = array<i64: 1, 128>}, {transform_indices = @transform_7, window_bounds = array<i64: 1, 80, 128>}]} {
    %cst = arith.constant 0.000000e+00 : f32
    %0 = vector.broadcast %cst : f32 to vector<80x8xf32>
    %cst_0 = arith.constant 0.000000e+00 : f32
    %1 = vector.broadcast %cst_0 : f32 to vector<80x128xf32>
    %c0 = arith.constant 0 : index
    %c0_1 = arith.constant 0 : index
    %c0_2 = arith.constant 0 : index
    %2 = vector.load %arg1[%c0, %c0_1, %c0_2] : memref<1x100x16xf32, #tpu.memory_space<vmem>>, vector<1x80x16xf32>
    %3 = vector.shape_cast %2 : vector<1x80x16xf32> to vector<80x16xf32>
    %c0_3 = arith.constant 0 : index
    %c0_4 = arith.constant 0 : index
    %c0_5 = arith.constant 0 : index
    %4 = vector.load %arg2[%c0_3, %c0_4, %c0_5] : memref<4x16x8xf32, #tpu.memory_space<vmem>>, vector<1x16x8xf32>
    %5 = vector.shape_cast %4 : vector<1x16x8xf32> to vector<16x8xf32>
    %cst_6 = arith.constant dense<0.000000e+00> : vector<80x8xf32>
    %6 = tpu.matmul %3, %5, %cst_6 {dimension_numbers = #tpu.dot_dimension_numbers<[1], [0], [0], [1], [0, 0, 1, 1], [], []>} : vector<80x16xf32>, vector<16x8xf32>, vector<80x8xf32> -> vector<80x8xf32>
    %7 = arith.addf %0, %6 : vector<80x8xf32>
    %c0_7 = arith.constant 0 : index
    %c0_8 = arith.constant 0 : index
    %c0_9 = arith.constant 0 : index
    %8 = vector.load %arg6[%c0_7, %c0_8, %c0_9] : memref<4x16x128xf32, #tpu.memory_space<vmem>>, vector<1x16x128xf32>
    %9 = vector.shape_cast %8 : vector<1x16x128xf32> to vector<16x128xf32>
    %cst_10 = arith.constant dense<0.000000e+00> : vector<80x128xf32>
    %10 = tpu.matmul %3, %9, %cst_10 {dimension_numbers = #tpu.dot_dimension_numbers<[1], [0], [0], [1], [0, 0, 1, 1], [], []>} : vector<80x16xf32>, vector<16x128xf32>, vector<80x128xf32> -> vector<80x128xf32>
    %11 = arith.addf %1, %10 : vector<80x128xf32>
    %c0_11 = arith.constant 0 : index
    %c1 = arith.constant 1 : index
    %c0_12 = arith.constant 0 : index
    %12 = vector.load %arg1[%c0_11, %c1, %c0_12] : memref<1x100x16xf32, #tpu.memory_space<vmem>>, vector<1x80x16xf32>
    %13 = vector.shape_cast %12 : vector<1x80x16xf32> to vector<80x16xf32>
    %c1_13 = arith.constant 1 : index
    %c0_14 = arith.constant 0 : index
    %c0_15 = arith.constant 0 : index
    %14 = vector.load %arg2[%c1_13, %c0_14, %c0_15] : memref<4x16x8xf32, #tpu.memory_space<vmem>>, vector<1x16x8xf32>
    %15 = vector.shape_cast %14 : vector<1x16x8xf32> to vector<16x8xf32>
    %cst_16 = arith.constant dense<0.000000e+00> : vector<80x8xf32>
    %16 = tpu.matmul %13, %15, %cst_16 {dimension_numbers = #tpu.dot_dimension_numbers<[1], [0], [0], [1], [0, 0, 1, 1], [], []>} : vector<80x16xf32>, vector<16x8xf32>, vector<80x8xf32> -> vector<80x8xf32>
    %17 = arith.addf %7, %16 : vector<80x8xf32>
    %c1_17 = arith.constant 1 : index
    %c0_18 = arith.constant 0 : index
    %c0_19 = arith.constant 0 : index
    %18 = vector.load %arg6[%c1_17, %c0_18, %c0_19] : memref<4x16x128xf32, #tpu.memory_space<vmem>>, vector<1x16x128xf32>
    %19 = vector.shape_cast %18 : vector<1x16x128xf32> to vector<16x128xf32>
    %cst_20 = arith.constant dense<0.000000e+00> : vector<80x128xf32>
    %20 = tpu.matmul %13, %19, %cst_20 {dimension_numbers = #tpu.dot_dimension_numbers<[1], [0], [0], [1], [0, 0, 1, 1], [], []>} : vector<80x16xf32>, vector<16x128xf32>, vector<80x128xf32> -> vector<80x128xf32>
    %21 = arith.addf %11, %20 : vector<80x128xf32>
    %c0_21 = arith.constant 0 : index
    %c10 = arith.constant 10 : index
    %c0_22 = arith.constant 0 : index
    %22 = vector.load %arg1[%c0_21, %c10, %c0_22] : memref<1x100x16xf32, #tpu.memory_space<vmem>>, vector<1x80x16xf32>
    %23 = vector.shape_cast %22 : vector<1x80x16xf32> to vector<80x16xf32>
    %c2 = arith.constant 2 : index
    %c0_23 = arith.constant 0 : index
    %c0_24 = arith.constant 0 : index
    %24 = vector.load %arg2[%c2, %c0_23, %c0_24] : memref<4x16x8xf32, #tpu.memory_space<vmem>>, vector<1x16x8xf32>
    %25 = vector.shape_cast %24 : vector<1x16x8xf32> to vector<16x8xf32>
    %cst_25 = arith.constant dense<0.000000e+00> : vector<80x8xf32>
    %26 = tpu.matmul %23, %25, %cst_25 {dimension_numbers = #tpu.dot_dimension_numbers<[1], [0], [0], [1], [0, 0, 1, 1], [], []>} : vector<80x16xf32>, vector<16x8xf32>, vector<80x8xf32> -> vector<80x8xf32>
    %27 = arith.addf %17, %26 : vector<80x8xf32>
    %c2_26 = arith.constant 2 : index
    %c0_27 = arith.constant 0 : index
    %c0_28 = arith.constant 0 : index
    %28 = vector.load %arg6[%c2_26, %c0_27, %c0_28] : memref<4x16x128xf32, #tpu.memory_space<vmem>>, vector<1x16x128xf32>
    %29 = vector.shape_cast %28 : vector<1x16x128xf32> to vector<16x128xf32>
    %cst_29 = arith.constant dense<0.000000e+00> : vector<80x128xf32>
    %30 = tpu.matmul %23, %29, %cst_29 {dimension_numbers = #tpu.dot_dimension_numbers<[1], [0], [0], [1], [0, 0, 1, 1], [], []>} : vector<80x16xf32>, vector<16x128xf32>, vector<80x128xf32> -> vector<80x128xf32>
    %31 = arith.addf %21, %30 : vector<80x128xf32>
    %c0_30 = arith.constant 0 : index
    %c11 = arith.constant 11 : index
    %c0_31 = arith.constant 0 : index
    %32 = vector.load %arg1[%c0_30, %c11, %c0_31] : memref<1x100x16xf32, #tpu.memory_space<vmem>>, vector<1x80x16xf32>
    %33 = vector.shape_cast %32 : vector<1x80x16xf32> to vector<80x16xf32>
    %c3 = arith.constant 3 : index
    %c0_32 = arith.constant 0 : index
    %c0_33 = arith.constant 0 : index
    %34 = vector.load %arg2[%c3, %c0_32, %c0_33] : memref<4x16x8xf32, #tpu.memory_space<vmem>>, vector<1x16x8xf32>
    %35 = vector.shape_cast %34 : vector<1x16x8xf32> to vector<16x8xf32>
    %cst_34 = arith.constant dense<0.000000e+00> : vector<80x8xf32>
    %36 = tpu.matmul %33, %35, %cst_34 {dimension_numbers = #tpu.dot_dimension_numbers<[1], [0], [0], [1], [0, 0, 1, 1], [], []>} : vector<80x16xf32>, vector<16x8xf32>, vector<80x8xf32> -> vector<80x8xf32>
    %37 = arith.addf %27, %36 : vector<80x8xf32>
    %c3_35 = arith.constant 3 : index
    %c0_36 = arith.constant 0 : index
    %c0_37 = arith.constant 0 : index
    %38 = vector.load %arg6[%c3_35, %c0_36, %c0_37] : memref<4x16x128xf32, #tpu.memory_space<vmem>>, vector<1x16x128xf32>
    %39 = vector.shape_cast %38 : vector<1x16x128xf32> to vector<16x128xf32>
    %cst_38 = arith.constant dense<0.000000e+00> : vector<80x128xf32>
    %40 = tpu.matmul %33, %39, %cst_38 {dimension_numbers = #tpu.dot_dimension_numbers<[1], [0], [0], [1], [0, 0, 1, 1], [], []>} : vector<80x16xf32>, vector<16x128xf32>, vector<80x128xf32> -> vector<80x128xf32>
    %41 = arith.addf %31, %40 : vector<80x128xf32>
    %c0_39 = arith.constant 0 : index
    %c0_40 = arith.constant 0 : index
    %42 = vector.load %arg3[%c0_39, %c0_40] : memref<1x8xf32, #tpu.memory_space<vmem>>, vector<1x8xf32>
    %43 = vector.broadcast %42 : vector<1x8xf32> to vector<80x8xf32>
    %44 = arith.addf %37, %43 : vector<80x8xf32>
    %cst_41 = arith.constant 0.000000e+00 : f32
    %45 = vector.broadcast %cst_41 : f32 to vector<80x8xf32>
    %46 = arith.maximumf %44, %45 : vector<80x8xf32>
    %47 = tpu.iota {dimensions = array<i32: 0>} : vector<80x1xi32>
    %c10_i32 = arith.constant 10 : i32
    %c0_i32 = arith.constant 0 : i32
    %48 = arith.cmpi eq, %c10_i32, %c0_i32 : i32
    %c1_i32 = arith.constant 1 : i32
    %49 = arith.select %48, %c1_i32, %c10_i32 : i32
    %50 = vector.broadcast %49 : i32 to vector<80x1xi32>
    %51 = arith.remsi %47, %50 : vector<80x1xi32>
    %c0_i32_42 = arith.constant 0 : i32
    %52 = vector.broadcast %c0_i32_42 : i32 to vector<80x1xi32>
    %53 = arith.cmpi ne, %51, %52 : vector<80x1xi32>
    %c0_i32_43 = arith.constant 0 : i32
    %54 = vector.broadcast %c0_i32_43 : i32 to vector<80x1xi32>
    %55 = arith.cmpi slt, %51, %54 : vector<80x1xi32>
    %c0_i32_44 = arith.constant 0 : i32
    %56 = arith.cmpi slt, %49, %c0_i32_44 : i32
    %57 = vector.broadcast %56 : i1 to vector<80x1xi1>
    %58 = vector.broadcast %57 : vector<80x1xi1> to vector<80x1xi1>
    %59 = arith.xori %55, %58 : vector<80x1xi1>
    %60 = arith.andi %59, %53 : vector<80x1xi1>
    %61 = vector.broadcast %49 : i32 to vector<80x1xi32>
    %62 = arith.addi %51, %61 : vector<80x1xi32>
    %63 = arith.select %60, %62, %51 : vector<80x1xi1>, vector<80x1xi32>
    %c8_i32 = arith.constant 8 : i32
    %64 = vector.broadcast %c8_i32 : i32 to vector<80x1xi32>
    %65 = arith.cmpi slt, %63, %64 : vector<80x1xi32>
    %cst_45 = arith.constant 0.000000e+00 : f32
    %66 = vector.shape_cast %65 : vector<80x1xi1> to vector<80x1xi1>
    %67 = vector.broadcast %66 : vector<80x1xi1> to vector<80x8xi1>
    %68 = vector.broadcast %cst_45 : f32 to vector<80x8xf32>
    %69 = arith.select %67, %46, %68 : vector<80x8xi1>, vector<80x8xf32>
    %cst_46 = arith.constant 0.000000e+00 : f32
    %70 = vector.broadcast %cst_46 : f32 to vector<11x8xf32>
    %c0_47 = arith.constant 0 : index
    %c0_48 = arith.constant 0 : index
    %71 = vector.load %arg9[%c0_47, %c0_48] : memref<104x8xf32, #tpu.memory_space<vmem>>, vector<11x8xf32>
    tpu.vector_store %arg9[%c0_47, %c0_48], %70 {strides = array<i32>} : memref<104x8xf32, #tpu.memory_space<vmem>>, vector<11x8xf32>,
    %cst_49 = arith.constant 0.000000e+00 : f32
    %72 = vector.broadcast %cst_49 : f32 to vector<13x8xf32>
    %c91 = arith.constant 91 : index
    %c0_50 = arith.constant 0 : index
    %73 = vector.load %arg9[%c91, %c0_50] : memref<104x8xf32, #tpu.memory_space<vmem>>, vector<13x8xf32>
    tpu.vector_store %arg9[%c91, %c0_50], %72 {strides = array<i32>} : memref<104x8xf32, #tpu.memory_space<vmem>>, vector<13x8xf32>,
    %c11_51 = arith.constant 11 : index
    %c0_52 = arith.constant 0 : index
    %74 = vector.load %arg9[%c11_51, %c0_52] : memref<104x8xf32, #tpu.memory_space<vmem>>, vector<80x8xf32>
    tpu.vector_store %arg9[%c11_51, %c0_52], %69 {strides = array<i32>} : memref<104x8xf32, #tpu.memory_space<vmem>>, vector<80x8xf32>,
    %cst_53 = arith.constant 0.000000e+00 : f32
    %75 = vector.broadcast %cst_53 : f32 to vector<80x128xf32>
    %c0_54 = arith.constant 0 : index
    %c0_55 = arith.constant 0 : index
    %76 = vector.load %arg9[%c0_54, %c0_55] : memref<104x8xf32, #tpu.memory_space<vmem>>, vector<80x8xf32>
    %c0_56 = arith.constant 0 : index
    %c0_57 = arith.constant 0 : index
    %c0_58 = arith.constant 0 : index
    %77 = vector.load %arg4[%c0_56, %c0_57, %c0_58] : memref<9x8x128xf32, #tpu.memory_space<vmem>>, vector<1x8x128xf32>
    %78 = vector.shape_cast %77 : vector<1x8x128xf32> to vector<8x128xf32>
    %cst_59 = arith.constant dense<0.000000e+00> : vector<80x128xf32>
    %79 = tpu.matmul %76, %78, %cst_59 {dimension_numbers = #tpu.dot_dimension_numbers<[1], [0], [0], [1], [0, 0, 1, 1], [], []>} : vector<80x8xf32>, vector<8x128xf32>, vector<80x128xf32> -> vector<80x128xf32>
    %80 = arith.addf %75, %79 : vector<80x128xf32>
    %c1_60 = arith.constant 1 : index
    %c0_61 = arith.constant 0 : index
    %81 = vector.load %arg9[%c1_60, %c0_61] : memref<104x8xf32, #tpu.memory_space<vmem>>, vector<80x8xf32>
    %c1_62 = arith.constant 1 : index
    %c0_63 = arith.constant 0 : index
    %c0_64 = arith.constant 0 : index
    %82 = vector.load %arg4[%c1_62, %c0_63, %c0_64] : memref<9x8x128xf32, #tpu.memory_space<vmem>>, vector<1x8x128xf32>
    %83 = vector.shape_cast %82 : vector<1x8x128xf32> to vector<8x128xf32>
    %cst_65 = arith.constant dense<0.000000e+00> : vector<80x128xf32>
    %84 = tpu.matmul %81, %83, %cst_65 {dimension_numbers = #tpu.dot_dimension_numbers<[1], [0], [0], [1], [0, 0, 1, 1], [], []>} : vector<80x8xf32>, vector<8x128xf32>, vector<80x128xf32> -> vector<80x128xf32>
    %85 = arith.addf %80, %84 : vector<80x128xf32>
    %c2_66 = arith.constant 2 : index
    %c0_67 = arith.constant 0 : index
    %86 = vector.load %arg9[%c2_66, %c0_67] : memref<104x8xf32, #tpu.memory_space<vmem>>, vector<80x8xf32>
    %c2_68 = arith.constant 2 : index
    %c0_69 = arith.constant 0 : index
    %c0_70 = arith.constant 0 : index
    %87 = vector.load %arg4[%c2_68, %c0_69, %c0_70] : memref<9x8x128xf32, #tpu.memory_space<vmem>>, vector<1x8x128xf32>
    %88 = vector.shape_cast %87 : vector<1x8x128xf32> to vector<8x128xf32>
    %cst_71 = arith.constant dense<0.000000e+00> : vector<80x128xf32>
    %89 = tpu.matmul %86, %88, %cst_71 {dimension_numbers = #tpu.dot_dimension_numbers<[1], [0], [0], [1], [0, 0, 1, 1], [], []>} : vector<80x8xf32>, vector<8x128xf32>, vector<80x128xf32> -> vector<80x128xf32>
    %90 = arith.addf %85, %89 : vector<80x128xf32>
    %c10_72 = arith.constant 10 : index
    %c0_73 = arith.constant 0 : index
    %91 = vector.load %arg9[%c10_72, %c0_73] : memref<104x8xf32, #tpu.memory_space<vmem>>, vector<80x8xf32>
    %c3_74 = arith.constant 3 : index
    %c0_75 = arith.constant 0 : index
    %c0_76 = arith.constant 0 : index
    %92 = vector.load %arg4[%c3_74, %c0_75, %c0_76] : memref<9x8x128xf32, #tpu.memory_space<vmem>>, vector<1x8x128xf32>
    %93 = vector.shape_cast %92 : vector<1x8x128xf32> to vector<8x128xf32>
    %cst_77 = arith.constant dense<0.000000e+00> : vector<80x128xf32>
    %94 = tpu.matmul %91, %93, %cst_77 {dimension_numbers = #tpu.dot_dimension_numbers<[1], [0], [0], [1], [0, 0, 1, 1], [], []>} : vector<80x8xf32>, vector<8x128xf32>, vector<80x128xf32> -> vector<80x128xf32>
    %95 = arith.addf %90, %94 : vector<80x128xf32>
    %c11_78 = arith.constant 11 : index
    %c0_79 = arith.constant 0 : index
    %96 = vector.load %arg9[%c11_78, %c0_79] : memref<104x8xf32, #tpu.memory_space<vmem>>, vector<80x8xf32>
    %c4 = arith.constant 4 : index
    %c0_80 = arith.constant 0 : index
    %c0_81 = arith.constant 0 : index
    %97 = vector.load %arg4[%c4, %c0_80, %c0_81] : memref<9x8x128xf32, #tpu.memory_space<vmem>>, vector<1x8x128xf32>
    %98 = vector.shape_cast %97 : vector<1x8x128xf32> to vector<8x128xf32>
    %cst_82 = arith.constant dense<0.000000e+00> : vector<80x128xf32>
    %99 = tpu.matmul %96, %98, %cst_82 {dimension_numbers = #tpu.dot_dimension_numbers<[1], [0], [0], [1], [0, 0, 1, 1], [], []>} : vector<80x8xf32>, vector<8x128xf32>, vector<80x128xf32> -> vector<80x128xf32>
    %100 = arith.addf %95, %99 : vector<80x128xf32>
    %c12 = arith.constant 12 : index
    %c0_83 = arith.constant 0 : index
    %101 = vector.load %arg9[%c12, %c0_83] : memref<104x8xf32, #tpu.memory_space<vmem>>, vector<80x8xf32>
    %c5 = arith.constant 5 : index
    %c0_84 = arith.constant 0 : index
    %c0_85 = arith.constant 0 : index
    %102 = vector.load %arg4[%c5, %c0_84, %c0_85] : memref<9x8x128xf32, #tpu.memory_space<vmem>>, vector<1x8x128xf32>
    %103 = vector.shape_cast %102 : vector<1x8x128xf32> to vector<8x128xf32>
    %cst_86 = arith.constant dense<0.000000e+00> : vector<80x128xf32>
    %104 = tpu.matmul %101, %103, %cst_86 {dimension_numbers = #tpu.dot_dimension_numbers<[1], [0], [0], [1], [0, 0, 1, 1], [], []>} : vector<80x8xf32>, vector<8x128xf32>, vector<80x128xf32> -> vector<80x128xf32>
    %105 = arith.addf %100, %104 : vector<80x128xf32>
    %c20 = arith.constant 20 : index
    %c0_87 = arith.constant 0 : index
    %106 = vector.load %arg9[%c20, %c0_87] : memref<104x8xf32, #tpu.memory_space<vmem>>, vector<80x8xf32>
    %c6 = arith.constant 6 : index
    %c0_88 = arith.constant 0 : index
    %c0_89 = arith.constant 0 : index
    %107 = vector.load %arg4[%c6, %c0_88, %c0_89] : memref<9x8x128xf32, #tpu.memory_space<vmem>>, vector<1x8x128xf32>
    %108 = vector.shape_cast %107 : vector<1x8x128xf32> to vector<8x128xf32>
    %cst_90 = arith.constant dense<0.000000e+00> : vector<80x128xf32>
    %109 = tpu.matmul %106, %108, %cst_90 {dimension_numbers = #tpu.dot_dimension_numbers<[1], [0], [0], [1], [0, 0, 1, 1], [], []>} : vector<80x8xf32>, vector<8x128xf32>, vector<80x128xf32> -> vector<80x128xf32>
    %110 = arith.addf %105, %109 : vector<80x128xf32>
    %c21 = arith.constant 21 : index
    %c0_91 = arith.constant 0 : index
    %111 = vector.load %arg9[%c21, %c0_91] : memref<104x8xf32, #tpu.memory_space<vmem>>, vector<80x8xf32>
    %c7 = arith.constant 7 : index
    %c0_92 = arith.constant 0 : index
    %c0_93 = arith.constant 0 : index
    %112 = vector.load %arg4[%c7, %c0_92, %c0_93] : memref<9x8x128xf32, #tpu.memory_space<vmem>>, vector<1x8x128xf32>
    %113 = vector.shape_cast %112 : vector<1x8x128xf32> to vector<8x128xf32>
    %cst_94 = arith.constant dense<0.000000e+00> : vector<80x128xf32>
    %114 = tpu.matmul %111, %113, %cst_94 {dimension_numbers = #tpu.dot_dimension_numbers<[1], [0], [0], [1], [0, 0, 1, 1], [], []>} : vector<80x8xf32>, vector<8x128xf32>, vector<80x128xf32> -> vector<80x128xf32>
    %115 = arith.addf %110, %114 : vector<80x128xf32>
    %c22 = arith.constant 22 : index
    %c0_95 = arith.constant 0 : index
    %116 = vector.load %arg9[%c22, %c0_95] : memref<104x8xf32, #tpu.memory_space<vmem>>, vector<80x8xf32>
    %c8 = arith.constant 8 : index
    %c0_96 = arith.constant 0 : index
    %c0_97 = arith.constant 0 : index
    %117 = vector.load %arg4[%c8, %c0_96, %c0_97] : memref<9x8x128xf32, #tpu.memory_space<vmem>>, vector<1x8x128xf32>
    %118 = vector.shape_cast %117 : vector<1x8x128xf32> to vector<8x128xf32>
    %cst_98 = arith.constant dense<0.000000e+00> : vector<80x128xf32>
    %119 = tpu.matmul %116, %118, %cst_98 {dimension_numbers = #tpu.dot_dimension_numbers<[1], [0], [0], [1], [0, 0, 1, 1], [], []>} : vector<80x8xf32>, vector<8x128xf32>, vector<80x128xf32> -> vector<80x128xf32>
    %120 = arith.addf %115, %119 : vector<80x128xf32>
    %c0_99 = arith.constant 0 : index
    %c0_100 = arith.constant 0 : index
    %121 = vector.load %arg5[%c0_99, %c0_100] : memref<1x128xf32, #tpu.memory_space<vmem>>, vector<1x128xf32>
    %122 = vector.broadcast %121 : vector<1x128xf32> to vector<80x128xf32>
    %123 = arith.addf %120, %122 : vector<80x128xf32>
    %cst_101 = arith.constant 0.000000e+00 : f32
    %124 = vector.broadcast %cst_101 : f32 to vector<80x128xf32>
    %125 = arith.maximumf %123, %124 : vector<80x128xf32>
    %126 = arith.addf %125, %41 : vector<80x128xf32>
    %c0_102 = arith.constant 0 : index
    %c0_103 = arith.constant 0 : index
    %127 = vector.load %arg7[%c0_102, %c0_103] : memref<1x128xf32, #tpu.memory_space<vmem>>, vector<1x128xf32>
    %128 = vector.broadcast %127 : vector<1x128xf32> to vector<80x128xf32>
    %129 = arith.addf %126, %128 : vector<80x128xf32>
    %c0_104 = arith.constant 0 : index
    %c0_105 = arith.constant 0 : index
    %c0_106 = arith.constant 0 : index
    %130 = vector.load %arg8[%c0_104, %c0_105, %c0_106] : memref<1x80x128xf32, #tpu.memory_space<vmem>>, vector<1x80x128xf32>
    %131 = vector.shape_cast %130 : vector<1x80x128xf32> to vector<80x128xf32>
    %132 = vector.shape_cast %129 : vector<80x128xf32> to vector<1x80x128xf32>
    tpu.vector_store %arg8[%c0_104, %c0_105, %c0_106], %132 {strides = array<i32>} : memref<1x80x128xf32, #tpu.memory_space<vmem>>, vector<1x80x128xf32>,
    return
  }
  func.func @transform_0(%arg0: i32) -> (i32, i32, i32) {
    %c0_i32 = arith.constant 0 : i32
    %c0_i32_0 = arith.constant 0 : i32
    %c0_i32_1 = arith.constant 0 : i32
    return %arg0, %c0_i32, %c0_i32_0 : i32, i32, i32
  }
  func.func @transform_1(%arg0: i32) -> (i32, i32, i32) {
    %c0_i32 = arith.constant 0 : i32
    %c0_i32_0 = arith.constant 0 : i32
    %c0_i32_1 = arith.constant 0 : i32
    %c0_i32_2 = arith.constant 0 : i32
    return %c0_i32, %c0_i32_0, %c0_i32_1 : i32, i32, i32
  }
  func.func @transform_2(%arg0: i32) -> (i32, i32) {
    %c0_i32 = arith.constant 0 : i32
    %c0_i32_0 = arith.constant 0 : i32
    %c0_i32_1 = arith.constant 0 : i32
    return %c0_i32, %c0_i32_0 : i32, i32
  }
  func.func @transform_3(%arg0: i32) -> (i32, i32, i32) {
    %c0_i32 = arith.constant 0 : i32
    %c0_i32_0 = arith.constant 0 : i32
    %c0_i32_1 = arith.constant 0 : i32
    %c0_i32_2 = arith.constant 0 : i32
    return %c0_i32, %c0_i32_0, %c0_i32_1 : i32, i32, i32
  }
  func.func @transform_4(%arg0: i32) -> (i32, i32) {
    %c0_i32 = arith.constant 0 : i32
    %c0_i32_0 = arith.constant 0 : i32
    %c0_i32_1 = arith.constant 0 : i32
    return %c0_i32, %c0_i32_0 : i32, i32
  }
  func.func @transform_5(%arg0: i32) -> (i32, i32, i32) {
    %c0_i32 = arith.constant 0 : i32
    %c0_i32_0 = arith.constant 0 : i32
    %c0_i32_1 = arith.constant 0 : i32
    %c0_i32_2 = arith.constant 0 : i32
    return %c0_i32, %c0_i32_0, %c0_i32_1 : i32, i32, i32
  }
  func.func @transform_6(%arg0: i32) -> (i32, i32) {
    %c0_i32 = arith.constant 0 : i32
    %c0_i32_0 = arith.constant 0 : i32
    %c0_i32_1 = arith.constant 0 : i32
    return %c0_i32, %c0_i32_0 : i32, i32
  }
  func.func @transform_7(%arg0: i32) -> (i32, i32, i32) {
    %c0_i32 = arith.constant 0 : i32
    %c0_i32_0 = arith.constant 0 : i32
    %c0_i32_1 = arith.constant 0 : i32
    return %arg0, %c0_i32, %c0_i32_0 : i32, i32, i32
  }
}

</mosaic_0001>

<bundles_post_ra>
// kernel: downblock_forward.1
= control target key start
LH: loop header
LB: loop body
LE: loop exit
PB: predicated region body
PF: predicated region fallthrough
CT: control target
= control target key end

     0   :  { %s4234_s24 = smov 0   ;;  %s4813_s0 = inlined_call_operand.vmem [shape: f32[2,100,16], index: 0, kind: input, shape index: {}]   ;;  %s4814_s1 = inlined_call_operand.vmem [shape: f32[4,16,8], index: 1, kind: input, shape index: {}]   ;;  %s4815_s2 = inlined_call_operand.vmem [shape: f32[1,8], index: 2, kind: input, shape index: {}]   ;;  %s4816_s3 = inlined_call_operand.vmem [shape: f32[9,8,128], index: 3, kind: input, shape index: {}]   ;;  %s4817_s4 = inlined_call_operand.vmem [shape: f32[1,128], index: 4, kind: input, shape index: {}]   ;;  %s4818_s5 = inlined_call_operand.vmem [shape: f32[4,16,128], index: 5, kind: input, shape index: {}]   ;;  %s4819_s6 = inlined_call_operand.vmem [shape: f32[1,128], index: 6, kind: input, shape index: {}]   ;;  %s4820_s7 = inlined_call_operand.vmem [shape: f32[2,80,128], index: 7, kind: output, shape index: {}]  }
   0x1 LB: > { %s3278_s25 = sadd.s32 4294967295, %s4191_s24   ;;  %p3282_p0 = scmp.ge.s32.totalorder %s4191_s24, 1  ;;  %s4191_s24 = sphi %s4234_s24, %s17_s24  }
   0x2   : > { %p237_p1 = scmp.lt.s32.totalorder %s4191_s24, 3 }
   0x4   : > { %p238_p2 = pnand %p3282_p0, %p237_p1 }
   0x5   : > { %v3285_v0 = vld [vmem:[%s4814_s1 + $0x10] sm:$0xff] (!%p238_p2)  ;;  %v3286_v1 = vld [vmem:[%s4814_s1 + $0x18] sm:$0xff] (!%p238_p2)  ;;  %p269_p3 = scmp.lt.s32.totalorder (!%p238_p2), %s3278_s25, 1  ;;  %v289_v2 = vld [vmem:[%s4814_s1] sm:$0xff] (!%p238_p2)  ;;  %vm306_vm0 = vcmask (!%p238_p2), 130048   ;;  %vm1660_vm1 = vcmask (!%p238_p2), 64512  }
   0x6   : > { %241 = sbr.rel (%p238_p2) target bundleno = 757 (0x2f5), region = 48  ;;  %v3980_v3 = vpack.c.bf16 (!%p238_p2), %v3286_v1, %v3285_v0  ;;  %v290_v4 = vld [vmem:[%s4814_s1 + $0x8] sm:$0xff] (!%p238_p2)  ;;  %v3307_v6 = vld [vmem:[%s4818_s5 + $0x10] sm:$0xff] (!%p238_p2)  ;;  %v3308_v7 = vld [vmem:[%s4818_s5 + $0x18] sm:$0xff] (!%p238_p2)  ;;  %v4193_v0 = vmov (!%p238_p2), 0.0   ;;  %vm1662_vm2 = vcmask (!%p238_p2), 59392  }
   0x7   : > { %v3984_v5 = vpack.c.bf16 (!%p238_p2), %v290_v4, %v289_v2  ;;  %v3988_v11 = vpack.c.bf16 (!%p238_p2), %v3308_v7, %v3307_v6  ;;  %v291_v20 = vld [vmem:[%s4818_s5] sm:$0xff] (!%p238_p2)  ;;  %v292_v21 = vld [vmem:[%s4818_s5 + $0x8] sm:$0xff] (!%p238_p2)  ;;  %v3353_v39 = vld [vmem:[%s4814_s1 + $0x30] sm:$0xff] (!%p238_p2)  ;;  %1661 = vst.msk [vmem:[#allocation2] sm:$0xff] (!%p238_p2), %vm1660_vm1, %v4193_v0  ;;  %v1449_v4 = vlaneseq (!%p238_p2) }
   0x8   : > { %3981 = vmatprep.subr.bf16.mxu1 (!%p238_p2), %v3980_v3  ;;  %v3992_v24 = vpack.c.bf16 (!%p238_p2), %v292_v21, %v291_v20  ;;  %v3329_v32 = vld [vmem:[%s4814_s1 + $0x20] sm:$0xff] (!%p238_p2)  ;;  %v3330_v33 = vld [vmem:[%s4814_s1 + $0x28] sm:$0xff] (!%p238_p2)  ;;  %v3354_v40 = vld [vmem:[%s4814_s1 + $0x38] sm:$0xff] (!%p238_p2)  ;;  %1664 = vst.msk [vmem:[#allocation2 + $0x5b] sm:$0xff] (!%p238_p2), %vm1660_vm1, %v4193_v0 }
   0x9   : > { %3983 = vmatpush3.bf16.msra.mxu1 (!%p238_p2), %v3980_v3  ;;  %v3996_v34 = vpack.c.bf16 (!%p238_p2), %v3330_v33, %v3329_v32  ;;  %v3341_v35 = vld [vmem:[%s4818_s5 + $0x20] sm:$0xff] (!%p238_p2)  ;;  %v3342_v36 = vld [vmem:[%s4818_s5 + $0x28] sm:$0xff] (!%p238_p2)  ;;  %v4004_v43 = vpack.c.bf16 (!%p238_p2), %v3354_v40, %v3353_v39  ;;  %v3365_v51 = vld [vmem:[%s4818_s5 + $0x30] sm:$0xff] (!%p238_p2)  ;;  %1663 = vst.msk [vmem:[#allocation2 + $0x8] sm:$0x7] (!%p238_p2), %vm1662_vm2, %v4193_v0 }
   0xa   : > { %3985 = vmatprep.subr.bf16.mxu1 (!%p238_p2), %v3984_v5  ;;  %v4000_v37 = vpack.c.bf16 (!%p238_p2), %v3342_v36, %v3341_v35  ;;  %v3366_v52 = vld [vmem:[%s4818_s5 + $0x38] sm:$0xff] (!%p238_p2)  ;;  %v3378_v1 = vld [vmem:[%s4816_s3 + $0x8] sm:$0xff] (!%p238_p2)  ;;  %v4430_v3 = vld [vmem:[%s4816_s3] sm:$0xff] (!%p238_p2) }
   0xb   : > { %v4008_v53 = vpack.c.bf16 (!%p238_p2), %v3366_v52, %v3365_v51  ;;  %3827 = vmatprep.subr.mxu0 (!%p238_p2), %v3378_v1 }
   0xc   : > { %3828 = vmatpush3.msra.mxu0 (!%p238_p2), %v3378_v1 }
   0xd   : > { %s4852_s25 = smov (!%p269_p3, %s3278_s25), 1  ;;  %3844 = vmatprep.subr.mxu0 %v4430_v3 }
   0xe   : > { %s4154_s11 = smul.u32 104, %s4852_s25 }
   0xf   : > { %s4155_s19 = smul.u32 80, %s4852_s25 }
  0x10   : > { %s4266_s18 = scalar_lea.vmem %s4813_s0, %s4154_s11  ;;  %v1688_v2 = vld [vmem:[#allocation2 + $0x1] sm:$0xff] }
  0x11   : > { %v293_v8 = vld [vmem:[%s4266_s18 + $0x1] sm:$0xff]  ;;  %v294_v9 = vld [vmem:[%s4266_s18 + $0x9] sm:$0xff]  ;;  %v295_v10 = vld [vmem:[%s4266_s18 + $0x11] sm:$0xff]  ;;  %3829 = vmatprep.mubr.msk.f32.mxu0 %vm1660_vm1, %v1688_v2  ;;  %s4789_s26 = scalar_lea.vmem %s4820_s7, %s4155_s19 }
  0x12   : > { %3679 = vmatprep.mubr.msk.f32.mxu1 %vm306_vm0, %v293_v8  ;;  %v296_v12 = vld [vmem:[%s4266_s18 + $0x19] sm:$0xff]  ;;  %v297_v13 = vld [vmem:[%s4266_s18 + $0x21] sm:$0xff]  ;;  %v298_v14 = vld [vmem:[%s4266_s18 + $0x29] sm:$0xff] }
  0x13   : > { %3680 = vmatmul.mubr.msk.f32.vlgmr.msra.gmra.mrb[0].mxu1 %vm306_vm0, %v294_v9  ;;  %v299_v15 = vld [vmem:[%s4266_s18 + $0x31] sm:$0xff]  ;;  %v300_v16 = vld [vmem:[%s4266_s18 + $0x39] sm:$0xff]  ;;  %v301_v17 = vld [vmem:[%s4266_s18 + $0x41] sm:$0xff] }
  0x14   : > { %3987 = vmatpush3.bf16.msra.mxu1 %v3984_v5  ;;  %3682 = vmatprep.mubr.msk.f32.mxu1 %vm306_vm0, %v295_v10  ;;  %v302_v18 = vld [vmem:[%s4266_s18 + $0x49] sm:$0xff]  ;;  %v279_v19 = vld [vmem:[%s4266_s18] sm:$0xff]  ;;  %v282_v25 = vld [vmem:[%s4266_s18 + $0x18] sm:$0xff]  ;;  %v1450_v5 = vshrl.u32 %v1449_v4, 7 }
  0x15   : > { %3989 = vmatprep.subr.bf16.mxu1 %v3988_v11  ;;  %v280_v22 = vld [vmem:[%s4266_s18 + $0x8] sm:$0xff]  ;;  %v281_v23 = vld [vmem:[%s4266_s18 + $0x10] sm:$0xff]  ;;  %v283_v26 = vld [vmem:[%s4266_s18 + $0x20] sm:$0xff] }
  0x16   : > { %v284_v27 = vld [vmem:[%s4266_s18 + $0x28] sm:$0xff]  ;;  %v285_v28 = vld [vmem:[%s4266_s18 + $0x30] sm:$0xff]  ;;  %v286_v29 = vld [vmem:[%s4266_s18 + $0x38] sm:$0xff]  ;;  %v1451_v6 = vadd.s32 8, %v1450_v5  ;;  %v4467_v40 = vadd.s32 64, %v1450_v5 }
  0x17   : > { %3683 = vmatmul.mubr.msk.f32.gmra.mrb[2].mxu1 %vm306_vm0, %v296_v12  ;;  %v287_v30 = vld [vmem:[%s4266_s18 + $0x40] sm:$0xff]  ;;  %v288_v31 = vld [vmem:[%s4266_s18 + $0x48] sm:$0xff]  ;;  %v831_v41 = vld [vmem:[%s4266_s18 + $0x12] sm:$0xff] }
  0x18   : > { %3685 = vmatprep.mubr.msk.f32.mxu1 %vm306_vm0, %v297_v13  ;;  %v830_v38 = vld [vmem:[%s4266_s18 + $0xa] sm:$0xff]  ;;  %v832_v42 = vld [vmem:[%s4266_s18 + $0x1a] sm:$0xff]  ;;  %v833_v44 = vld [vmem:[%s4266_s18 + $0x22] sm:$0xff] }
  0x19   : > { %v834_v45 = vld [vmem:[%s4266_s18 + $0x2a] sm:$0xff]  ;;  %v835_v46 = vld [vmem:[%s4266_s18 + $0x32] sm:$0xff]  ;;  %v836_v47 = vld [vmem:[%s4266_s18 + $0x3a] sm:$0xff] }
  0x1a   : > { %v837_v48 = vld [vmem:[%s4266_s18 + $0x42] sm:$0xff]  ;;  %v838_v49 = vld [vmem:[%s4266_s18 + $0x4a] sm:$0xff]  ;;  %v839_v50 = vld [vmem:[%s4266_s18 + $0x52] sm:$0xff] }
  0x1b   : > { %3686 = vmatmul.mubr.msk.f32.gmra.mrb[4].mxu1 %vm306_vm0, %v298_v14  ;;  %v1126_v54 = vld [vmem:[%s4266_s18 + $0xb] sm:$0xff]  ;;  %v1127_v55 = vld [vmem:[%s4266_s18 + $0x13] sm:$0xff]  ;;  %v1128_v56 = vld [vmem:[%s4266_s18 + $0x1b] sm:$0xff] }
  0x1c   : > { %3688 = vmatprep.mubr.msk.f32.mxu1 %vm306_vm0, %v299_v15  ;;  %v1129_v57 = vld [vmem:[%s4266_s18 + $0x23] sm:$0xff]  ;;  %v1130_v58 = vld [vmem:[%s4266_s18 + $0x2b] sm:$0xff]  ;;  %v1131_v59 = vld [vmem:[%s4266_s18 + $0x33] sm:$0xff] }
  0x1d   : > { %v1132_v60 = vld [vmem:[%s4266_s18 + $0x3b] sm:$0xff]  ;;  %v1133_v61 = vld [vmem:[%s4266_s18 + $0x43] sm:$0xff]  ;;  %v1134_v62 = vld [vmem:[%s4266_s18 + $0x4b] sm:$0xff] }
  0x1e   : > { %v1135_v63 = vld [vmem:[%s4266_s18 + $0x53] sm:$0xff]  ;;  %v4500_v2 = vld [vmem:[%s4815_s2] ss:$0 sm:$0xff] }
  0x1f   : > { %3689 = vmatmul.mubr.msk.f32.gmra.mrb[6].mxu1 %vm306_vm0, %v300_v16 }
  0x20   : > { %3691 = vmatprep.mubr.msk.f32.mxu1 %vm306_vm0, %v301_v17 }
  0x23   : > { %3692 = vmatmul.mubr.msk.f32.gmra.mrb[8].mxu1 %vm306_vm0, %v302_v18 }
  0x24   : > { %3698 = vmatprep.mubr.msk.f32.mxu1 %vm306_vm0, %v279_v19 }
  0x27   : > { %3699 = vmatmul.mubr.msk.f32.vlgmr.msra.gmra.mrb[0].mxu1 %vm306_vm0, %v280_v22 }
  0x28   : > { %3991 = vmatpush3.bf16.msra.mxu1 %v3988_v11  ;;  %3701 = vmatprep.mubr.msk.f32.mxu1 %vm306_vm0, %v281_v23  ;;  %v1453_v11 = vadd.s32 24, %v1450_v5 }
  0x29   : > { %3993 = vmatprep.subr.bf16.mxu1 %v3992_v24 }
  0x2b   : > { %3702 = vmatmul.mubr.msk.f32.gmra.mrb[2].mxu1 %vm306_vm0, %v282_v25 }
  0x2c   : > { %3704 = vmatprep.mubr.msk.f32.mxu1 %vm306_vm0, %v283_v26 }
  0x2f   : > { %3705 = vmatmul.mubr.msk.f32.gmra.mrb[4].mxu1 %vm306_vm0, %v284_v27 }
  0x30   : > { %3707 = vmatprep.mubr.msk.f32.mxu1 %vm306_vm0, %v285_v28 }
  0x33   : > { %3708 = vmatmul.mubr.msk.f32.gmra.mrb[6].mxu1 %vm306_vm0, %v286_v29 }
  0x34   : > { %3710 = vmatprep.mubr.msk.f32.mxu1 %vm306_vm0, %v287_v30 }
  0x37   : > { %3711 = vmatmul.mubr.msk.f32.gmra.mrb[8].mxu1 %vm306_vm0, %v288_v31 }
  0x38   : > { %3717 = vmatprep.mubr.msk.f32.mxu1 %vm306_vm0, %v293_v8  ;;  %v4433_v7 = vmul.u32.u64.low 3435973837, %v1451_v6  ;;  %v4434_v8 = vmul.u32.u64.high 3435973837, %v1451_v6, %v4433_v7 }
  0x3b   : > { %3718 = vmatmul.mubr.msk.f32.vlgmr.msra.gmra.mrb[10].mxu1 %vm306_vm0, %v294_v9 }
  0x3c   : > { %3995 = vmatpush3.bf16.msra.mxu1 %v3992_v24  ;;  %3720 = vmatprep.mubr.msk.f32.mxu1 %vm306_vm0, %v295_v10  ;;  %v4436_v9 = vmul.u32.u64.low 3435973837, %v1450_v5  ;;  %v4437_v10 = vmul.u32.u64.high 3435973837, %v1450_v5, %v4436_v9 }
  0x3d   : > { %3997 = vmatprep.subr.bf16.mxu1 %v3996_v34 }
  0x3f   : > { %3721 = vmatmul.mubr.msk.f32.gmra.mrb[12].mxu1 %vm306_vm0, %v296_v12  ;;  %v1452_v12 = vadd.s32 16, %v1450_v5 }
  0x40   : > { %3723 = vmatprep.mubr.msk.f32.mxu1 %vm306_vm0, %v297_v13 }
  0x43   : > { %3724 = vmatmul.mubr.msk.f32.gmra.mrb[14].mxu1 %vm306_vm0, %v298_v14  ;;  %v4439_v13 = vmul.u32.u64.low 3435973837, %v1453_v11  ;;  %v4440_v14 = vmul.u32.u64.high 3435973837, %v1453_v11, %v4439_v13 }
  0x44   : > { %3726 = vmatprep.mubr.msk.f32.mxu1 %vm306_vm0, %v299_v15  ;;  %v1455_v15 = vadd.s32 40, %v1450_v5 }
  0x46   : > { %v4447_v20 = vmul.u32.u64.low 3435973837, %v1455_v15  ;;  %v4448_v21 = vmul.u32.u64.high 3435973837, %v1455_v15, %v4447_v20 }
  0x47   : > { %3727 = vmatmul.mubr.msk.f32.gmra.mrb[16].mxu1 %vm306_vm0, %v300_v16  ;;  %v1477_v16 = vshrl.u32 %v4434_v8, 3 }
  0x48   : > { %3729 = vmatprep.mubr.msk.f32.mxu1 %vm306_vm0, %v301_v17  ;;  %v1466_v17 = vshrl.u32 %v4437_v10, 3  ;;  %v1521_v39 = vshrl.u32 %v4448_v21, 3 }
  0x4a   : > { %v1467_v24 = vmul.u32 10, %v1466_v17 }
  0x4b   : > { %3730 = vmatmul.mubr.msk.f32.gmra.mrb[18].mxu1 %vm306_vm0, %v302_v18 }
  0x4c   : > { %3736 = vmatprep.mubr.msk.f32.mxu1 %vm306_vm0, %v279_v19  ;;  %v4444_v18 = vmul.u32.u64.low 3435973837, %v1452_v12  ;;  %v4445_v19 = vmul.u32.u64.high 3435973837, %v1452_v12, %v4444_v18 }
  0x4e   : > { %v1488_v32 = vshrl.u32 %v4445_v19, 3 }
  0x4f   : > { %3737 = vmatmul.mubr.msk.f32.vlgmr.msra.gmra.mrb[10].mxu1 %vm306_vm0, %v280_v22  ;;  %v1454_v22 = vadd.s32 32, %v1450_v5 }
  0x50   : > { %3999 = vmatpush3.bf16.msra.mxu1 %v3996_v34  ;;  %3739 = vmatprep.mubr.msk.f32.mxu1 %vm306_vm0, %v281_v23  ;;  %v1478_v23 = vmul.u32 10, %v1477_v16 }
  0x51   : > { %4001 = vmatprep.subr.bf16.mxu1 %v4000_v37 }
  0x53   : > { %3740 = vmatmul.mubr.msk.f32.gmra.mrb[12].mxu1 %vm306_vm0, %v282_v25  ;;  %v1457_v25 = vadd.s32 56, %v1450_v5 }
  0x54   : > { %3742 = vmatprep.mubr.msk.f32.mxu1 %vm306_vm0, %v283_v26  ;;  %v1499_v26 = vshrl.u32 %v4440_v14, 3 }
  0x55   : > { %v4457_v33 = vmul.u32.u64.low 3435973837, %v1457_v25  ;;  %v4458_v34 = vmul.u32.u64.high 3435973837, %v1457_v25, %v4457_v33 }
  0x56   : > { %v1500_v35 = vmul.u32 10, %v1499_v26 }
  0x57   : > { %3743 = vmatmul.mubr.msk.f32.gmra.mrb[14].mxu1 %vm306_vm0, %v284_v27  ;;  %v4451_v27 = vadd.s32 48, %v1450_v5  ;;  %v1543_v52 = vshrl.u32 %v4458_v34, 3 }
  0x58   : > { %3745 = vmatprep.mubr.msk.f32.mxu1 %vm306_vm0, %v285_v28 }
  0x5b   : > { %3746 = vmatmul.mubr.msk.f32.gmra.mrb[16].mxu1 %vm306_vm0, %v286_v29  ;;  %v4453_v28 = vmul.u32.u64.low 3435973837, %v1454_v22  ;;  %v4454_v29 = vmul.u32.u64.high 3435973837, %v1454_v22, %v4453_v28 }
  0x5c   : > { %3748 = vmatprep.mubr.msk.f32.mxu1 %vm306_vm0, %v287_v30  ;;  %v1479_v30 = vsub.s32 %v1451_v6, %v1478_v23 }
  0x5e   : > { %vm1571_vm3 = vcmp.ne.s32.totalorder %v1479_v30, 0  ;;  %vm1581_vm4 = vcmp.lt.s32.totalorder %v1479_v30, 0 }
  0x5f   : > { %3749 = vmatmul.mubr.msk.f32.gmra.mrb[18].mxu1 %vm306_vm0, %v288_v31  ;;  %v1468_v31 = vsub.s32 %v1450_v5, %v1467_v24  ;;  %vm4478_vm7 = vmand %vm1581_vm4, %vm1571_vm3 }
  0x60   : > { %3755 = vmatprep.mubr.msk.f32.mxu1 %vm306_vm0, %v830_v38 }
  0x61   : > { %vm1570_vm5 = vcmp.ne.s32.totalorder %v1468_v31, 0  ;;  %vm1580_vm6 = vcmp.lt.s32.totalorder %v1468_v31, 0  ;;  %v1600_v51 = vadd.s32 10, %v1468_v31 }
  0x62   : > { %vm4483_vm8 = vmand %vm1580_vm6, %vm1570_vm5 }
  0x63   : > { %3756 = vmatmul.mubr.msk.f32.vlgmr.msra.gmra.mrb[0].mxu1 %vm306_vm0, %v831_v41 }
  0x64   : > { %4003 = vmatpush3.bf16.msra.mxu1 %v4000_v37  ;;  %3758 = vmatprep.mubr.msk.f32.mxu1 %vm306_vm0, %v832_v42  ;;  %v4461_v36 = vmul.u32.u64.low 3435973837, %v4451_v27  ;;  %v4462_v37 = vmul.u32.u64.high 3435973837, %v4451_v27, %v4461_v36 }
  0x65   : > { %4005 = vmatprep.subr.bf16.mxu1 %v4004_v43 }
  0x67   : > { %3759 = vmatmul.mubr.msk.f32.gmra.mrb[2].mxu1 %vm306_vm0, %v833_v44 }
  0x68   : > { %3761 = vmatprep.mubr.msk.f32.mxu1 %vm306_vm0, %v834_v45 }
  0x6b   : > { %3762 = vmatmul.mubr.msk.f32.gmra.mrb[4].mxu1 %vm306_vm0, %v835_v46 }
  0x6c   : > { %3764 = vmatprep.mubr.msk.f32.mxu1 %vm306_vm0, %v836_v47 }
  0x6f   : > { %3765 = vmatmul.mubr.msk.f32.gmra.mrb[6].mxu1 %vm306_vm0, %v837_v48 }
  0x70   : > { %3767 = vmatprep.mubr.msk.f32.mxu1 %vm306_vm0, %v838_v49 }
  0x73   : > { %3768 = vmatmul.mubr.msk.f32.gmra.mrb[8].mxu1 %vm306_vm0, %v839_v50 }
  0x74   : > { %3774 = vmatprep.mubr.msk.f32.mxu1 %vm306_vm0, %v830_v38  ;;  %v4464_v38 = vadd.s32 72, %v1450_v5 }
  0x77   : > { %3775 = vmatmul.mubr.msk.f32.vlgmr.msra.gmra.mrb[10].mxu1 %vm306_vm0, %v831_v41  ;;  %v1501_v41 = vsub.s32 %v1453_v11, %v1500_v35 }
  0x78   : > { %4007 = vmatpush3.bf16.msra.mxu1 %v4004_v43  ;;  %3777 = vmatprep.mubr.msk.f32.mxu1 %vm306_vm0, %v832_v42  ;;  %v1489_v42 = vmul.u32 10, %v1488_v32 }
  0x79   : > { %4009 = vmatprep.subr.bf16.mxu1 %v4008_v53  ;;  %vm1573_vm9 = vcmp.ne.s32.totalorder %v1501_v41, 0  ;;  %vm1583_vm10 = vcmp.lt.s32.totalorder %v1501_v41, 0 }
  0x7a   : > { %vm4492_vm11 = vmand %vm1583_vm10, %vm1573_vm9 }
  0x7b   : > { %3778 = vmatmul.mubr.msk.f32.gmra.mrb[12].mxu1 %vm306_vm0, %v833_v44  ;;  %v4470_v43 = vmul.u32.u64.low 3435973837, %v4464_v38  ;;  %v4471_v44 = vmul.u32.u64.high 3435973837, %v4464_v38, %v4470_v43 }
  0x7c   : > { %3780 = vmatprep.mubr.msk.f32.mxu1 %vm306_vm0, %v834_v45  ;;  %v1522_v45 = vmul.u32 10, %v1521_v39 }
  0x7f   : > { %3781 = vmatmul.mubr.msk.f32.gmra.mrb[14].mxu1 %vm306_vm0, %v835_v46  ;;  %v1510_v46 = vshrl.u32 %v4454_v29, 3 }
  0x80   : > { %3783 = vmatprep.mubr.msk.f32.mxu1 %vm306_vm0, %v836_v47 }
  0x83   : > { %3784 = vmatmul.mubr.msk.f32.gmra.mrb[16].mxu1 %vm306_vm0, %v837_v48  ;;  %v4475_v47 = vmul.u32.u64.low 3435973837, %v4467_v40  ;;  %v4476_v48 = vmul.u32.u64.high 3435973837, %v4467_v40, %v4475_v47 }
  0x84   : > { %3786 = vmatprep.mubr.msk.f32.mxu1 %vm306_vm0, %v838_v49 }
  0x85   : > { %v1554_v5 = vshrl.u32 %v4476_v48, 3  ;;  %v3421_v48 = vld [vmem:[%s4816_s3 + $0x20] sm:$0xff] }
  0x87   : > { %3787 = vmatmul.mubr.msk.f32.gmra.mrb[18].mxu1 %vm306_vm0, %v839_v50  ;;  %v1601_v50 = vadd.s32 10, %v1479_v30  ;;  %v1555_v20 = vmul.u32 10, %v1554_v5  ;;  %v3399_v5 = vld [vmem:[%s4816_s3 + $0x10] sm:$0xff] }
  0x88   : > { %3793 = vmatprep.mubr.msk.f32.mxu1 %vm306_vm0, %v1126_v54 }
  0x89   : > { %v4562_v35 = vsub.s32 %v4467_v40, %v1555_v20 }
  0x8b   : > { %3794 = vmatmul.mubr.msk.f32.vlgmr.msra.gmra.mrb[0].mxu1 %vm306_vm0, %v1127_v55 }
  0x8c   : > { %3796 = vmatprep.mubr.msk.f32.mxu1 %vm306_vm0, %v1128_v56  ;;  %4011 = vmatpush3.bf16.msra.mxu1 %v4008_v53 }
  0x8d   : > { %4012 = vmatprep.subr.mxu1 %v3378_v1 }
  0x8f   : > { %3797 = vmatmul.mubr.msk.f32.gmra.mrb[2].mxu1 %vm306_vm0, %v1129_v57 }
  0x90   : > { %3799 = vmatprep.mubr.msk.f32.mxu1 %vm306_vm0, %v1130_v58 }
  0x93   : > { %3800 = vmatmul.mubr.msk.f32.gmra.mrb[4].mxu1 %vm306_vm0, %v1131_v59 }
  0x94   : > { %3802 = vmatprep.mubr.msk.f32.mxu1 %vm306_vm0, %v1132_v60 }
  0x97   : > { %3803 = vmatmul.mubr.msk.f32.gmra.mrb[6].mxu1 %vm306_vm0, %v1133_v61 }
  0x98   : > { %3805 = vmatprep.mubr.msk.f32.mxu1 %vm306_vm0, %v1134_v62 }
  0x9b   : > { %3806 = vmatmul.mubr.msk.f32.gmra.mrb[8].mxu1 %vm306_vm0, %v1135_v63 }
  0x9c   : > { %3812 = vmatprep.mubr.msk.f32.mxu1 %vm306_vm0, %v1126_v54  ;;  %v1490_v54 = vsub.s32 %v1452_v12, %v1489_v42 }
  0x9e   : > { %vm1572_vm12 = vcmp.ne.s32.totalorder %v1490_v54, 0  ;;  %vm1582_vm13 = vcmp.lt.s32.totalorder %v1490_v54, 0  ;;  %v1602_v6 = vadd.s32 10, %v1490_v54 }
  0x9f   : > { %3813 = vmatmul.mubr.msk.f32.vlgmr.msra.gmra.mrb[10].mxu1 %vm306_vm0, %v1127_v55  ;;  %v1532_v55 = vshrl.u32 %v4462_v37, 3  ;;  %vm4511_vm2 = vmand %vm1582_vm13, %vm1572_vm12 }
  0xa0   : > { %3815 = vmatprep.mubr.msk.f32.mxu1 %vm306_vm0, %v1128_v56  ;;  %4013 = vmatpush3.msra.mxu1 %v3378_v1  ;;  %v1523_v56 = vsub.s32 %v1455_v15, %v1522_v45  ;;  %v1565_v1 = vshrl.u32 %v4471_v44, 3  ;;  %v1612_v23 = vsel %vm4511_vm2, %v1602_v6, %v1490_v54 }
  0xa1   : > { %vm4565_vm13 = vcmp.lt.s32.totalorder %v1612_v23, 8 }
  0xa2   : > { %vm1575_vm14 = vcmp.ne.s32.totalorder %v1523_v56, 0  ;;  %vm1585_vm15 = vcmp.lt.s32.totalorder %v1523_v56, 0  ;;  %v1605_v11 = vadd.s32 10, %v1523_v56  ;;  %v1566_v18 = vmul.u32 10, %v1565_v1 }
  0xa3   : > { %3816 = vmatmul.mubr.msk.f32.gmra.mrb[12].mxu1 %vm306_vm0, %v1129_v57  ;;  %v1511_v57 = vmul.u32 10, %v1510_v46  ;;  %vm4522_vm4 = vmand %vm1585_vm15, %vm1575_vm14 }
  0xa4   : > { %3818 = vmatprep.mubr.msk.f32.mxu1 %vm306_vm0, %v1130_v58  ;;  %v1611_v58 = vsel %vm4478_vm7, %v1601_v50, %v1479_v30  ;;  %v4554_v32 = vsub.s32 %v4464_v38, %v1566_v18 }
  0xa5   : > { %v4502_v4 = vsub.s32 %v1454_v22, %v1511_v57  ;;  %v1608_v57 = vadd.s32 10, %v4562_v35  ;;  %v1677_v22 = vld [vmem:[#allocation2] sm:$0xff] }
  0xa7   : > { %3819 = vmatmul.mubr.msk.f32.gmra.mrb[14].mxu1 %vm306_vm0, %v1131_v59  ;;  %v1610_v59 = vsel %vm4483_vm8, %v1600_v51, %v1468_v31  ;;  %vm1574_vm5 = vcmp.ne.s32.totalorder %v4502_v4, 0  ;;  %vm1584_vm6 = vcmp.lt.s32.totalorder %v4502_v4, 0  ;;  %v1604_v24 = vadd.s32 10, %v4502_v4 }
  0xa8   : > { %3821 = vmatprep.mubr.msk.f32.mxu1 %vm306_vm0, %v1132_v60  ;;  %v1603_v60 = vadd.s32 10, %v1501_v41  ;;  %vm4518_vm3 = vcmp.lt.s32.totalorder %v1610_v59, 8  ;;  %vm4548_vm10 = vmand %vm1584_vm6, %vm1574_vm5  ;;  %vm1578_vm5 = vcmp.ne.s32.totalorder %v4562_v35, 0  ;;  %vm1588_vm6 = vcmp.lt.s32.totalorder %v4562_v35, 0 }
  0xa9   : > { %v1614_v40 = vsel %vm4548_vm10, %v1604_v24, %v4502_v4 }
  0xaa   : > { %v1613_v9 = vsel %vm4492_vm11, %v1603_v60, %v1501_v41 }
  0xab   : > { %3822 = vmatmul.mubr.msk.f32.gmra.mrb[16].mxu1 %vm306_vm0, %v1133_v61  ;;  %v1544_v61 = vmul.u32 10, %v1543_v52  ;;  %vm4532_vm7 = vcmp.lt.s32.totalorder %v1613_v9, 8 }
  0xac   : > { %3824 = vmatprep.mubr.msk.f32.mxu1 %vm306_vm0, %v1134_v62 }
  0xad   : > { %v4515_v12 = vsub.s32 %v1457_v25, %v1544_v61 }
  0xaf   : > { %3825 = vmatmul.mubr.msk.f32.gmra.mrb[18].mxu1 %vm306_vm0, %v1135_v63  ;;  %v1533_v63 = vmul.u32 10, %v1532_v55  ;;  %vm4505_vm0 = vcmp.lt.s32.totalorder %v1611_v58, 8  ;;  %vm1577_vm8 = vcmp.ne.s32.totalorder %v4515_v12, 0  ;;  %vm1587_vm9 = vcmp.lt.s32.totalorder %v4515_v12, 0 }
  0xb0   : > { %v1607_v39 = vadd.s32 10, %v4515_v12  ;;  %vm4581_vm15 = vmand %vm1587_vm9, %vm1577_vm8 }
  0xb1   : > { %v4527_v17 = vsub.s32 %v4451_v27, %v1533_v63  ;;  %v1615_v27 = vsel %vm4522_vm4, %v1605_v11, %v1523_v56  ;;  %vm1589_vm4 = vcmp.lt.s32.totalorder %v4554_v32, 0  ;;  %vm4628_vm9 = vmand %vm1588_vm6, %vm1578_vm5  ;;  %v3432_v56 = vld [vmem:[%s4816_s3 + $0x28] sm:$0xff] }
  0xb2   : > { %vm4569_vm14 = vcmp.lt.s32.totalorder %v1615_v27, 8  ;;  %v1617_v52 = vsel %vm4581_vm15, %v1607_v39, %v4515_v12  ;;  %v1618_v10 = vsel %vm4628_vm9, %v1608_v57, %v4562_v35  ;;  %v3410_v27 = vld [vmem:[%s4816_s3 + $0x18] sm:$0xff] }
  0xb3   : > { %vm1576_vm11 = vcmp.ne.s32.totalorder %v4527_v17, 0  ;;  %vm1586_vm12 = vcmp.lt.s32.totalorder %v4527_v17, 0  ;;  %v1606_v44 = vadd.s32 10, %v4527_v17  ;;  %vm1627_vm10 = vcmp.lt.s32.totalorder %v1617_v52, 8 }
  0xb4   : > { %vm4593_vm2 = vmand %vm1586_vm12, %vm1576_vm11 }
  0xb5   : > { %v1616_v55 = vsel %vm4593_vm2, %v1606_v44, %v4527_v17 }
  0xb6   : > { %vm1626_vm11 = vcmp.lt.s32.totalorder %v1616_v55, 8 }
 0x15e   : > { %v3795_v7 = vpop.f32.mrb[0].mxu1 }
 0x15f   : > { %v1430_v13 = vadd.f32 %v3795_v7, %v4500_v2  ;;  %v1235_v14 = vpop.f32.mrb[1].mxu1 }
 0x160   : > { %v1429_v19 = vadd.f32 %v4500_v2, %v1235_v14 }
 0x161   : > { %v1440_v21 = vmax.f32 %v1430_v13, 0.0 }
 0x162   : > { %v1439_v25 = vmax.f32 %v1429_v19, 0.0  ;;  %v3798_v26 = vpop.f32.mrb[2].mxu1 }
 0x163   : > { %v1651_v28 = vsel %vm4505_vm0, %v1440_v21, 0.0  ;;  %v1432_v29 = vadd.f32 %v3798_v26, %v4500_v2  ;;  %v1245_v30 = vpop.f32.mrb[3].mxu1  ;;  %vm1665_vm0 = vcmask 61440  }
 0x164   : > { %1668 = vst.msk [vmem:[#allocation2 + $0x13] sm:$0xff] %vm1660_vm1, %v1651_v28  ;;  %v1650_v33 = vsel %vm4518_vm3, %v1439_v25, 0.0  ;;  %v1431_v34 = vadd.f32 %v4500_v2, %v1245_v30  ;;  %vm1579_vm3 = vcmp.ne.s32.totalorder %v4554_v32, 0 }
 0x165   : > { %1667 = vst.msk [vmem:[#allocation2 + $0xb] sm:$0xff] %vm1660_vm1, %v1650_v33  ;;  %v1442_v36 = vmax.f32 %v1432_v29, 0.0  ;;  %vm4618_vm8 = vmand %vm1589_vm4, %vm1579_vm3 }
 0x166   : > { %v1441_v41 = vmax.f32 %v1431_v34, 0.0  ;;  %v3801_v42 = vpop.f32.mrb[4].mxu1  ;;  %1666 = vst.msk [vmem:[#allocation2 + $0x63] sm:$0x1f] %vm1665_vm0, %v4193_v0  ;;  %v1609_v0 = vadd.s32 10, %v4554_v32 }
 0x167   : > { %v1653_v45 = vsel %vm4532_vm7, %v1442_v36, 0.0  ;;  %v1434_v46 = vadd.f32 %v3801_v42, %v4500_v2  ;;  %v1255_v47 = vpop.f32.mrb[5].mxu1  ;;  %vm1624_vm7 = vcmp.lt.s32.totalorder %v1614_v40, 8 }
 0x168   : > { %1670 = vst.msk [vmem:[#allocation2 + $0x23] sm:$0xff] %vm1660_vm1, %v1653_v45  ;;  %v1652_v49 = vsel %vm4565_vm13, %v1441_v41, 0.0  ;;  %v1433_v50 = vadd.f32 %v4500_v2, %v1255_v47  ;;  %v1619_v7 = vsel %vm4618_vm8, %v1609_v0, %v4554_v32  ;;  %vm1628_vm13 = vcmp.lt.s32.totalorder %v1618_v10, 8  ;;  %v1990_v45 = vld [vmem:[#allocation2 + $0x2] sm:$0xff]  ;;  %v3454_v10 = vld [vmem:[%s4816_s3 + $0x38] sm:$0xff] }
 0x169   : > { %1669 = vst.msk [vmem:[#allocation2 + $0x1b] sm:$0xff] %vm1660_vm1, %v1652_v49  ;;  %v1444_v51 = vmax.f32 %v1434_v46, 0.0  ;;  %vm1629_vm12 = vcmp.lt.s32.totalorder %v1619_v7, 8 }
 0x16a   : > { %v1443_v53 = vmax.f32 %v1433_v50, 0.0  ;;  %v3804_v54 = vpop.f32.mrb[6].mxu1 }
 0x16b   : > { %v1655_v58 = vsel %vm4569_vm14, %v1444_v51, 0.0  ;;  %v1436_v59 = vadd.f32 %v3804_v54, %v4500_v2  ;;  %v1265_v60 = vpop.f32.mrb[7].mxu1 }
 0x16c   : > { %1672 = vst.msk [vmem:[#allocation2 + $0x33] sm:$0xff] %vm1660_vm1, %v1655_v58  ;;  %v1654_v62 = vsel %vm1624_vm7, %v1443_v53, 0.0  ;;  %v1435_v63 = vadd.f32 %v4500_v2, %v1265_v60  ;;  %v1689_v1 = vld [vmem:[#allocation2 + $0x9] sm:$0xff]  ;;  %v1690_v4 = vld [vmem:[#allocation2 + $0x11] sm:$0xff] }
 0x16d   : > { %1671 = vst.msk [vmem:[#allocation2 + $0x2b] sm:$0xff] %vm1660_vm1, %v1654_v62  ;;  %v1446_v6 = vmax.f32 %v1436_v59, 0.0  ;;  %3830 = vmatmul.mubr.msk.f32.vlgmr.msra.gmra.mrb[0].mxu0 %vm1660_vm1, %v1689_v1  ;;  %v1678_v29 = vld [vmem:[#allocation2 + $0x8] sm:$0xff]  ;;  %v1679_v32 = vld [vmem:[#allocation2 + $0x10] sm:$0xff] }
 0x16e   : > { %v1445_v8 = vmax.f32 %v1435_v63, 0.0  ;;  %3845 = vmatpush3.msra.mxu0 %v4430_v3  ;;  %v3807_v9 = vpop.f32.mrb[8].mxu1  ;;  %3832 = vmatprep.mubr.msk.f32.mxu0 %vm1660_vm1, %v1690_v4  ;;  %v1991_v47 = vld [vmem:[#allocation2 + $0xa] sm:$0xff]  ;;  %v1992_v49 = vld [vmem:[#allocation2 + $0x12] sm:$0xff] }
 0x16f   : > { %v1657_v11 = vsel %vm1627_vm10, %v1446_v6, 0.0  ;;  %v1438_v12 = vadd.f32 %v3807_v9, %v4500_v2  ;;  %v1275_v13 = vpop.f32.mrb[9].mxu1  ;;  %3861 = vmatprep.subr.mxu0 %v3399_v5  ;;  %v2324_v58 = vld [vmem:[#allocation2 + $0xb] sm:$0xff]  ;;  %v2325_v59 = vld [vmem:[#allocation2 + $0x13] sm:$0xff]  ;;  %v2327_v62 = vld [vmem:[#allocation2 + $0x23] sm:$0xff] }
 0x170   : > { %1674 = vst.msk [vmem:[#allocation2 + $0x43] sm:$0xff] %vm1660_vm1, %v1657_v11  ;;  %v1656_v14 = vsel %vm1626_vm11, %v1445_v8, 0.0  ;;  %v1437_v15 = vadd.f32 %v4500_v2, %v1275_v13  ;;  %v1691_v16 = vld [vmem:[#allocation2 + $0x19] sm:$0xff]  ;;  %v1692_v3 = vld [vmem:[#allocation2 + $0x21] sm:$0xff]  ;;  %v3443_v60 = vld [vmem:[%s4816_s3 + $0x30] sm:$0xff] }
 0x171   : > { %1673 = vst.msk [vmem:[#allocation2 + $0x3b] sm:$0xff] %vm1660_vm1, %v1656_v14  ;;  %v1448_v17 = vmax.f32 %v1438_v12, 0.0  ;;  %3833 = vmatmul.mubr.msk.f32.gmra.mrb[2].mxu0 %vm1660_vm1, %v1691_v16  ;;  %v1680_v35 = vld [vmem:[#allocation2 + $0x18] sm:$0xff]  ;;  %v1681_v36 = vld [vmem:[#allocation2 + $0x20] sm:$0xff]  ;;  %v2491_v8 = vld [vmem:[#allocation2 + $0xc] sm:$0xff] }
 0x172   : > { %v1447_v18 = vmax.f32 %v1437_v15, 0.0  ;;  %v4652_v19 = vpop.f32.mrb[10].mxu1  ;;  %3835 = vmatprep.mubr.msk.f32.mxu0 %vm1660_vm1, %v1692_v3  ;;  %v1993_v50 = vld [vmem:[#allocation2 + $0x1a] sm:$0xff]  ;;  %v1994_v51 = vld [vmem:[#allocation2 + $0x22] sm:$0xff] }
 0x173   : > { %v1659_v20 = vsel %vm1629_vm12, %v1448_v17, 0.0  ;;  %v4655_v21 = vpop.f32.mrb[11].mxu1  ;;  %v2326_v61 = vld [vmem:[#allocation2 + $0x1b] sm:$0xff]  ;;  %v2329_v1 = vld [vmem:[#allocation2 + $0x33] sm:$0xff] }
 0x174   : > { %1676 = vst.msk [vmem:[#allocation2 + $0x53] sm:$0xff] %vm1660_vm1, %v1659_v20  ;;  %v1658_v2 = vsel %vm1628_vm13, %v1447_v18, 0.0  ;;  %v1693_v23 = vld [vmem:[#allocation2 + $0x29] sm:$0xff]  ;;  %v1694_v24 = vld [vmem:[#allocation2 + $0x31] sm:$0xff]  ;;  %v2493_v11 = vld [vmem:[#allocation2 + $0x1c] sm:$0xff] }
 0x175   : > { %1675 = vst.msk [vmem:[#allocation2 + $0x4b] sm:$0xff] %vm1660_vm1, %v1658_v2  ;;  %3836 = vmatmul.mubr.msk.f32.gmra.mrb[4].mxu0 %vm1660_vm1, %v1693_v23  ;;  %3838 = vmatprep.mubr.msk.f32.mxu1 %vm1660_vm1, %v1694_v24  ;;  %v1682_v39 = vld [vmem:[#allocation2 + $0x28] sm:$0xff]  ;;  %v1683_v41 = vld [vmem:[#allocation2 + $0x30] sm:$0xff]  ;;  %v3465_v18 = vld [vmem:[%s4816_s3 + $0x40] sm:$0xff] }
 0x176   : > { %v4661_v25 = vpop.f32.mrb[12].mxu1  ;;  %3846 = vmatprep.mubr.msk.f32.mxu0 %vm1660_vm1, %v1677_v22  ;;  %v1995_v52 = vld [vmem:[#allocation2 + $0x2a] sm:$0xff]  ;;  %v1996_v0 = vld [vmem:[#allocation2 + $0x32] sm:$0xff]  ;;  %v2667_v20 = vld [vmem:[#allocation2 + $0x5c] sm:$0xff] }
 0x177   : > { %v4664_v26 = vpop.f32.mrb[13].mxu1  ;;  %v2328_v63 = vld [vmem:[#allocation2 + $0x2b] sm:$0xff]  ;;  %v2492_v9 = vld [vmem:[#allocation2 + $0x14] sm:$0xff]  ;;  %v2826_v2 = vld [vmem:[#allocation2 + $0x1d] sm:$0xff] }
 0x178   : > { %v1695_v28 = vld [vmem:[#allocation2 + $0x39] sm:$0xff]  ;;  %v1696_v30 = vld [vmem:[#allocation2 + $0x41] sm:$0xff]  ;;  %v2495_v13 = vld [vmem:[#allocation2 + $0x2c] sm:$0xff] }
 0x179   : > { %3839 = vmatmul.mubr.msk.f32.vlgmr.msra.gmra.mrb[20].mxu1 %vm1660_vm1, %v1695_v28  ;;  %3847 = vmatmul.mubr.msk.f32.vlgmr.msra.gmra.mrb[0].mxu0 %vm1660_vm1, %v1678_v29  ;;  %v1684_v43 = vld [vmem:[#allocation2 + $0x38] sm:$0xff]  ;;  %v1685_v44 = vld [vmem:[#allocation2 + $0x40] sm:$0xff]  ;;  %v2828_v24 = vld [vmem:[#allocation2 + $0x2d] sm:$0xff] }
 0x17a   : > { %3862 = vmatpush3.msra.mxu0 %v3399_v5  ;;  %v4671_v31 = vpop.f32.mrb[14].mxu1  ;;  %3841 = vmatprep.mubr.msk.f32.mxu1 %vm1660_vm1, %v1696_v30  ;;  %v1997_v53 = vld [vmem:[#allocation2 + $0x3a] sm:$0xff]  ;;  %v1998_v54 = vld [vmem:[#allocation2 + $0x42] sm:$0xff] }
 0x17b   : > { %3849 = vmatprep.mubr.msk.f32.mxu0 %vm1660_vm1, %v1679_v32  ;;  %v4675_v33 = vpop.f32.mrb[15].mxu1  ;;  %3878 = vmatprep.subr.mxu0 %v3410_v27  ;;  %v2330_v4 = vld [vmem:[#allocation2 + $0x3b] sm:$0xff]  ;;  %v2331_v5 = vld [vmem:[#allocation2 + $0x43] sm:$0xff]  ;;  %v2333_v7 = vld [vmem:[#allocation2 + $0x53] sm:$0xff] }
 0x17c   : > { %v1697_v34 = vld [vmem:[#allocation2 + $0x49] sm:$0xff]  ;;  %v2166_v57 = vld [vmem:[#allocation2 + $0x52] sm:$0xff]  ;;  %v2497_v15 = vld [vmem:[#allocation2 + $0x3c] sm:$0xff] }
 0x17d   : > { %3842 = vmatmul.mubr.msk.f32.gmra.mrb[22].mxu1 %vm1660_vm1, %v1697_v34  ;;  %3850 = vmatmul.mubr.msk.f32.gmra.mrb[2].mxu0 %vm1660_vm1, %v1680_v35  ;;  %v1686_v46 = vld [vmem:[#allocation2 + $0x48] sm:$0xff]  ;;  %v2496_v14 = vld [vmem:[#allocation2 + $0x34] sm:$0xff]  ;;  %v2830_v28 = vld [vmem:[#allocation2 + $0x3d] sm:$0xff] }
 0x17e   : > { %v4679_v37 = vpop.f32.mrb[16].mxu1  ;;  %3852 = vmatprep.mubr.msk.f32.mxu0 %vm1660_vm1, %v1681_v36  ;;  %v1999_v55 = vld [vmem:[#allocation2 + $0x4a] sm:$0xff]  ;;  %v2500_v17 = vld [vmem:[#allocation2 + $0x54] sm:$0xff]  ;;  %v2834_v34 = vld [vmem:[#allocation2 + $0x5d] sm:$0xff] }
 0x17f   : > { %v4682_v38 = vpop.f32.mrb[17].mxu1  ;;  %v2332_v6 = vld [vmem:[#allocation2 + $0x4b] sm:$0xff]  ;;  %v2825_v22 = vld [vmem:[#allocation2 + $0x15] sm:$0xff]  ;;  %v2993_v36 = vld [vmem:[#allocation2 + $0x1e] sm:$0xff] }
 0x180   : > { %v2494_v12 = vld [vmem:[#allocation2 + $0x24] sm:$0xff]  ;;  %v2499_v3 = vld [vmem:[#allocation2 + $0x4c] sm:$0xff]  ;;  %v2833_v32 = vld [vmem:[#allocation2 + $0x55] sm:$0xff] }
 0x181   : > { %3853 = vmatmul.mubr.msk.f32.gmra.mrb[4].mxu0 %vm1660_vm1, %v1682_v39  ;;  %v2498_v16 = vld [vmem:[#allocation2 + $0x44] sm:$0xff]  ;;  %v2832_v30 = vld [vmem:[#allocation2 + $0x4d] sm:$0xff]  ;;  %v2992_v35 = vld [vmem:[#allocation2 + $0x16] sm:$0xff] }
 0x182   : > { %v4685_v42 = vpop.f32.mrb[18].mxu1  ;;  %3855 = vmatprep.mubr.msk.f32.mxu0 %vm1660_vm1, %v1683_v41  ;;  %v2827_v23 = vld [vmem:[#allocation2 + $0x25] sm:$0xff]  ;;  %v2995_v41 = vld [vmem:[#allocation2 + $0x2e] sm:$0xff] }
 0x183   : > { %v4688_v40 = vpop.f32.mrb[19].mxu1  ;;  %v2831_v29 = vld [vmem:[#allocation2 + $0x45] sm:$0xff] }
 0x184   : > { %v2994_v39 = vld [vmem:[#allocation2 + $0x26] sm:$0xff] }
 0x185   : > { %3856 = vmatmul.mubr.msk.f32.gmra.mrb[6].mxu0 %vm1660_vm1, %v1684_v43  ;;  %v2996_v43 = vld [vmem:[#allocation2 + $0x36] sm:$0xff] }
 0x186   : > { %3858 = vmatprep.mubr.msk.f32.mxu0 %vm1660_vm1, %v1685_v44  ;;  %v2997_v44 = vld [vmem:[#allocation2 + $0x3e] sm:$0xff] }
 0x189   : > { %3859 = vmatmul.mubr.msk.f32.gmra.mrb[8].mxu0 %vm1660_vm1, %v1686_v46  ;;  %v2999_v46 = vld [vmem:[#allocation2 + $0x4e] sm:$0xff] }
 0x18a   : > { %3863 = vmatprep.mubr.msk.f32.mxu0 %vm1660_vm1, %v1990_v45  ;;  %v2998_v45 = vld [vmem:[#allocation2 + $0x46] sm:$0xff] }
 0x18d   : > { %3864 = vmatmul.mubr.msk.f32.vlgmr.msra.gmra.mrb[0].mxu0 %vm1660_vm1, %v1991_v47 }
 0x18e   : > { %3879 = vmatpush3.msra.mxu0 %v3410_v27  ;;  %3866 = vmatprep.mubr.msk.f32.mxu0 %vm1660_vm1, %v1992_v49  ;;  %v2829_v27 = vld [vmem:[#allocation2 + $0x35] sm:$0xff] }
 0x18f   : > { %3895 = vmatprep.subr.mxu0 %v3421_v48 }
 0x191   : > { %3867 = vmatmul.mubr.msk.f32.gmra.mrb[2].mxu0 %vm1660_vm1, %v1993_v50 }
 0x192   : > { %3869 = vmatprep.mubr.msk.f32.mxu0 %vm1660_vm1, %v1994_v51 }
 0x195   : > { %3870 = vmatmul.mubr.msk.f32.gmra.mrb[4].mxu0 %vm1660_vm1, %v1995_v52 }
 0x196   : > { %3872 = vmatprep.mubr.msk.f32.mxu0 %vm1660_vm1, %v1996_v0 }
 0x199   : > { %3873 = vmatmul.mubr.msk.f32.gmra.mrb[6].mxu0 %vm1660_vm1, %v1997_v53 }
 0x19a   : > { %3875 = vmatprep.mubr.msk.f32.mxu0 %vm1660_vm1, %v1998_v54 }
 0x19d   : > { %3876 = vmatmul.mubr.msk.f32.gmra.mrb[8].mxu0 %vm1660_vm1, %v1999_v55 }
 0x19e   : > { %3880 = vmatprep.mubr.msk.f32.mxu0 %vm1660_vm1, %v1991_v47  ;;  %v3000_v47 = vld [vmem:[#allocation2 + $0x56] sm:$0xff] }
 0x1a1   : > { %3881 = vmatmul.mubr.msk.f32.vlgmr.msra.gmra.mrb[0].mxu0 %vm1660_vm1, %v1992_v49 }
 0x1a2   : > { %3896 = vmatpush3.msra.mxu0 %v3421_v48  ;;  %3883 = vmatprep.mubr.msk.f32.mxu0 %vm1660_vm1, %v1993_v50  ;;  %v3001_v48 = vld [vmem:[#allocation2 + $0x5e] sm:$0xff] }
 0x1a3   : > { %3912 = vmatprep.subr.mxu0 %v3432_v56 }
 0x1a5   : > { %3884 = vmatmul.mubr.msk.f32.gmra.mrb[2].mxu0 %vm1660_vm1, %v1994_v51 }
 0x1a6   : > { %3886 = vmatprep.mubr.msk.f32.mxu0 %vm1660_vm1, %v1995_v52 }
 0x1a9   : > { %3887 = vmatmul.mubr.msk.f32.gmra.mrb[4].mxu0 %vm1660_vm1, %v1996_v0  ;;  %v3476_v0 = vld [vmem:[%s4817_s4] ss:$0 sm:$0xff] }
 0x1aa   : > { %3889 = vmatprep.mubr.msk.f32.mxu0 %vm1660_vm1, %v1997_v53 }
 0x1ad   : > { %3890 = vmatmul.mubr.msk.f32.gmra.mrb[6].mxu0 %vm1660_vm1, %v1998_v54 }
 0x1ae   : > { %3892 = vmatprep.mubr.msk.f32.mxu0 %vm1660_vm1, %v1999_v55 }
 0x1b1   : > { %3893 = vmatmul.mubr.msk.f32.gmra.mrb[8].mxu0 %vm1660_vm1, %v2166_v57 }
 0x1b2   : > { %3897 = vmatprep.mubr.msk.f32.mxu0 %vm1660_vm1, %v2324_v58  ;;  %v3477_v58 = vld [vmem:[%s4819_s6] ss:$0 sm:$0xff] }
 0x1b5   : > { %3898 = vmatmul.mubr.msk.f32.vlgmr.msra.gmra.mrb[0].mxu0 %vm1660_vm1, %v2325_v59 }
 0x1b6   : > { %3913 = vmatpush3.msra.mxu0 %v3432_v56  ;;  %3900 = vmatprep.mubr.msk.f32.mxu0 %vm1660_vm1, %v2326_v61 }
 0x1b7   : > { %3929 = vmatprep.subr.mxu0 %v3443_v60 }
 0x1b9   : > { %3901 = vmatmul.mubr.msk.f32.gmra.mrb[2].mxu0 %vm1660_vm1, %v2327_v62 }
 0x1ba   : > { %3903 = vmatprep.mubr.msk.f32.mxu0 %vm1660_vm1, %v2328_v63 }
 0x1bd   : > { %3904 = vmatmul.mubr.msk.f32.gmra.mrb[4].mxu0 %vm1660_vm1, %v2329_v1 }
 0x1be   : > { %3906 = vmatprep.mubr.msk.f32.mxu0 %vm1660_vm1, %v2330_v4 }
 0x1c1   : > { %3907 = vmatmul.mubr.msk.f32.gmra.mrb[6].mxu0 %vm1660_vm1, %v2331_v5 }
 0x1c2   : > { %3909 = vmatprep.mubr.msk.f32.mxu0 %vm1660_vm1, %v2332_v6 }
 0x1c5   : > { %3910 = vmatmul.mubr.msk.f32.gmra.mrb[8].mxu0 %vm1660_vm1, %v2333_v7 }
 0x1c6   : > { %3914 = vmatprep.mubr.msk.f32.mxu0 %vm1660_vm1, %v2491_v8 }
 0x1c9   : > { %3915 = vmatmul.mubr.msk.f32.vlgmr.msra.gmra.mrb[0].mxu0 %vm1660_vm1, %v2492_v9 }
 0x1ca   : > { %3930 = vmatpush3.msra.mxu0 %v3443_v60  ;;  %3917 = vmatprep.mubr.msk.f32.mxu0 %vm1660_vm1, %v2493_v11 }
 0x1cb   : > { %3946 = vmatprep.subr.mxu0 %v3454_v10 }
 0x1cd   : > { %3918 = vmatmul.mubr.msk.f32.gmra.mrb[2].mxu0 %vm1660_vm1, %v2494_v12 }
 0x1ce   : > { %3920 = vmatprep.mubr.msk.f32.mxu0 %vm1660_vm1, %v2495_v13 }
 0x1d1   : > { %3921 = vmatmul.mubr.msk.f32.gmra.mrb[4].mxu0 %vm1660_vm1, %v2496_v14 }
 0x1d2   : > { %3923 = vmatprep.mubr.msk.f32.mxu0 %vm1660_vm1, %v2497_v15 }
 0x1d5   : > { %3924 = vmatmul.mubr.msk.f32.gmra.mrb[6].mxu0 %vm1660_vm1, %v2498_v16 }
 0x1d6   : > { %3926 = vmatprep.mubr.msk.f32.mxu0 %vm1660_vm1, %v2499_v3 }
 0x1d9   : > { %3927 = vmatmul.mubr.msk.f32.gmra.mrb[8].mxu0 %vm1660_vm1, %v2500_v17 }
 0x1da   : > { %3931 = vmatprep.mubr.msk.f32.mxu0 %vm1660_vm1, %v2492_v9 }
 0x1dd   : > { %3932 = vmatmul.mubr.msk.f32.vlgmr.msra.gmra.mrb[0].mxu0 %vm1660_vm1, %v2493_v11 }
 0x1de   : > { %3947 = vmatpush3.msra.mxu0 %v3454_v10  ;;  %3934 = vmatprep.mubr.msk.f32.mxu0 %vm1660_vm1, %v2494_v12 }
 0x1df   : > { %3963 = vmatprep.subr.mxu0 %v3465_v18 }
 0x1e1   : > { %3935 = vmatmul.mubr.msk.f32.gmra.mrb[2].mxu0 %vm1660_vm1, %v2495_v13 }
 0x1e2   : > { %3937 = vmatprep.mubr.msk.f32.mxu0 %vm1660_vm1, %v2496_v14 }
 0x1e5   : > { %3938 = vmatmul.mubr.msk.f32.gmra.mrb[4].mxu0 %vm1660_vm1, %v2497_v15 }
 0x1e6   : > { %3940 = vmatprep.mubr.msk.f32.mxu0 %vm1660_vm1, %v2498_v16 }
 0x1e9   : > { %3941 = vmatmul.mubr.msk.f32.gmra.mrb[6].mxu0 %vm1660_vm1, %v2499_v3 }
 0x1ea   : > { %3943 = vmatprep.mubr.msk.f32.mxu0 %vm1660_vm1, %v2500_v17 }
 0x1ed   : > { %3944 = vmatmul.mubr.msk.f32.gmra.mrb[8].mxu0 %vm1660_vm1, %v2667_v20 }
 0x1ee   : > { %3948 = vmatprep.mubr.msk.f32.mxu0 %vm1660_vm1, %v2825_v22 }
 0x1f1   : > { %3949 = vmatmul.mubr.msk.f32.vlgmr.msra.gmra.mrb[0].mxu0 %vm1660_vm1, %v2826_v2 }
 0x1f2   : > { %3964 = vmatpush3.msra.mxu0 %v3465_v18  ;;  %3951 = vmatprep.mubr.msk.f32.mxu0 %vm1660_vm1, %v2827_v23 }
 0x1f5   : > { %3952 = vmatmul.mubr.msk.f32.gmra.mrb[2].mxu0 %vm1660_vm1, %v2828_v24 }
 0x1f6   : > { %3954 = vmatprep.mubr.msk.f32.mxu0 %vm1660_vm1, %v2829_v27 }
 0x1f9   : > { %3955 = vmatmul.mubr.msk.f32.gmra.mrb[4].mxu0 %vm1660_vm1, %v2830_v28 }
 0x1fa   : > { %3957 = vmatprep.mubr.msk.f32.mxu0 %vm1660_vm1, %v2831_v29 }
 0x1fd   : > { %3958 = vmatmul.mubr.msk.f32.gmra.mrb[6].mxu0 %vm1660_vm1, %v2832_v30 }
 0x1fe   : > { %3960 = vmatprep.mubr.msk.f32.mxu0 %vm1660_vm1, %v2833_v32 }
 0x201   : > { %3961 = vmatmul.mubr.msk.f32.gmra.mrb[8].mxu0 %vm1660_vm1, %v2834_v34 }
 0x202   : > { %3965 = vmatprep.mubr.msk.f32.mxu0 %vm1660_vm1, %v2992_v35 }
 0x205   : > { %3966 = vmatmul.mubr.msk.f32.vlgmr.msra.gmra.mrb[0].mxu0 %vm1660_vm1, %v2993_v36 }
 0x206   : > { %3968 = vmatprep.mubr.msk.f32.mxu0 %vm1660_vm1, %v2994_v39 }
 0x209   : > { %3969 = vmatmul.mubr.msk.f32.gmra.mrb[2].mxu0 %vm1660_vm1, %v2995_v41 }
 0x20a   : > { %3971 = vmatprep.mubr.msk.f32.mxu0 %vm1660_vm1, %v2996_v43 }
 0x20d   : > { %3972 = vmatmul.mubr.msk.f32.gmra.mrb[4].mxu0 %vm1660_vm1, %v2997_v44 }
 0x20e   : > { %3974 = vmatprep.mubr.msk.f32.mxu0 %vm1660_vm1, %v2998_v45 }
 0x211   : > { %3975 = vmatmul.mubr.msk.f32.gmra.mrb[6].mxu0 %vm1660_vm1, %v2999_v46 }
 0x212   : > { %3977 = vmatprep.mubr.msk.f32.mxu0 %vm1660_vm1, %v3000_v47 }
 0x215   : > { %3978 = vmatmul.mubr.msk.f32.gmra.mrb[8].mxu0 %vm1660_vm1, %v3001_v48 }
 0x24c   : > { %v3840_v49 = vpop.f32.mrb[20].mxu1 }
 0x24d   : > { %v1826_v50 = vpop.f32.mrb[21].mxu1 }
 0x250   : > { %v3843_v51 = vpop.f32.mrb[22].mxu1 }
 0x251   : > { %v1836_v52 = vpop.f32.mrb[23].mxu1 }
 0x2d8   : > { %v3967_v53 = vpop.f32.mrb[0].mxu0 }
 0x2d9   : > { %v3167_v54 = vadd.f32 %v3967_v53, %v3476_v0  ;;  %v3100_v55 = vpop.f32.mrb[1].mxu0 }
 0x2da   : > { %v3166_v56 = vadd.f32 %v3476_v0, %v3100_v55 }
 0x2db   : > { %v3177_v57 = vmax.f32 %v3167_v54, 0.0 }
 0x2dc   : > { %v3176_v59 = vmax.f32 %v3166_v56, 0.0  ;;  %v3970_v60 = vpop.f32.mrb[2].mxu0 }
 0x2dd   : > { %v3187_v61 = vadd.f32 %v4652_v19, %v3177_v57  ;;  %v3169_v62 = vadd.f32 %v3970_v60, %v3476_v0  ;;  %v3110_v63 = vpop.f32.mrb[3].mxu0 }
 0x2de   : > { %v3186_v1 = vadd.f32 %v3176_v59, %v4655_v21  ;;  %v3168_v4 = vadd.f32 %v3476_v0, %v3110_v63 }
 0x2df   : > { %v3204_v5 = vadd.f32 %v3477_v58, %v3187_v61  ;;  %v3179_v6 = vmax.f32 %v3169_v62, 0.0 }
 0x2e0   : > { %v3203_v7 = vadd.f32 %v3477_v58, %v3186_v1  ;;  %v3178_v8 = vmax.f32 %v3168_v4, 0.0  ;;  %v3973_v9 = vpop.f32.mrb[4].mxu0 }
 0x2e1   : > { %3214 = vst [vmem:[%s4789_s26 + $0x8] sm:$0xff] %v3204_v5  ;;  %v3189_v19 = vadd.f32 %v4661_v25, %v3179_v6  ;;  %v3171_v10 = vadd.f32 %v3973_v9, %v3476_v0  ;;  %v3120_v11 = vpop.f32.mrb[5].mxu0 }
 0x2e2   : > { %3213 = vst [vmem:[%s4789_s26] sm:$0xff] %v3203_v7  ;;  %v3188_v12 = vadd.f32 %v3178_v8, %v4664_v26  ;;  %v3170_v13 = vadd.f32 %v3476_v0, %v3120_v11 }
 0x2e3   : > { %v3206_v14 = vadd.f32 %v3477_v58, %v3189_v19  ;;  %v3181_v15 = vmax.f32 %v3171_v10, 0.0 }
 0x2e4   : > { %v3205_v21 = vadd.f32 %v3477_v58, %v3188_v12  ;;  %v3180_v16 = vmax.f32 %v3170_v13, 0.0  ;;  %v3976_v3 = vpop.f32.mrb[6].mxu0 }
 0x2e5   : > { %3216 = vst [vmem:[%s4789_s26 + $0x18] sm:$0xff] %v3206_v14  ;;  %v3191_v17 = vadd.f32 %v4671_v31, %v3181_v15  ;;  %v4014_v18 = vadd.f32 %v3976_v3, %v3840_v49  ;;  %v3130_v20 = vpop.f32.mrb[7].mxu0 }
 0x2e6   : > { %3215 = vst [vmem:[%s4789_s26 + $0x10] sm:$0xff] %v3205_v21  ;;  %v3190_v25 = vadd.f32 %v3180_v16, %v4675_v33  ;;  %v4015_v22 = vadd.f32 %v3130_v20, %v1826_v50 }
 0x2e7   : > { %v3208_v2 = vadd.f32 %v3477_v58, %v3191_v17  ;;  %v3173_v23 = vadd.f32 %v4014_v18, %v3476_v0 }
 0x2e8   : > { %v3207_v26 = vadd.f32 %v3477_v58, %v3190_v25  ;;  %v3172_v24 = vadd.f32 %v4015_v22, %v3476_v0  ;;  %v3979_v27 = vpop.f32.mrb[8].mxu0 }
 0x2e9   : > { %3218 = vst [vmem:[%s4789_s26 + $0x28] sm:$0xff] %v3208_v2  ;;  %v3183_v28 = vmax.f32 %v3173_v23, 0.0  ;;  %v4016_v29 = vadd.f32 %v3979_v27, %v3843_v51  ;;  %v3140_v30 = vpop.f32.mrb[9].mxu0 }
 0x2ea   : > { %3217 = vst [vmem:[%s4789_s26 + $0x20] sm:$0xff] %v3207_v26  ;;  %v3182_v32 = vmax.f32 %v3172_v24, 0.0  ;;  %v4017_v31 = vadd.f32 %v3140_v30, %v1836_v52 }
 0x2eb   : > { %v3193_v34 = vadd.f32 %v4679_v37, %v3183_v28  ;;  %v3175_v33 = vadd.f32 %v4016_v29, %v3476_v0 }
 0x2ec   : > { %v3192_v35 = vadd.f32 %v3182_v32, %v4682_v38  ;;  %v3174_v36 = vadd.f32 %v4017_v31, %v3476_v0 }
 0x2ed   : > { %v3210_v39 = vadd.f32 %v3477_v58, %v3193_v34  ;;  %v3185_v41 = vmax.f32 %v3175_v33, 0.0 }
 0x2ee   : > { %v3209_v43 = vadd.f32 %v3477_v58, %v3192_v35  ;;  %v3184_v44 = vmax.f32 %v3174_v36, 0.0 }
 0x2ef   : > { %3220 = vst [vmem:[%s4789_s26 + $0x38] sm:$0xff] %v3210_v39  ;;  %v3195_v45 = vadd.f32 %v4685_v42, %v3185_v41 }
 0x2f0   : > { %3219 = vst [vmem:[%s4789_s26 + $0x30] sm:$0xff] %v3209_v43  ;;  %v3194_v46 = vadd.f32 %v3184_v44, %v4688_v40 }
 0x2f1   : > { %v3212_v47 = vadd.f32 %v3477_v58, %v3195_v45 }
 0x2f2   : > { %v3211_v48 = vadd.f32 %v3477_v58, %v3194_v46 }
 0x2f3   : > { %3222 = vst [vmem:[%s4789_s26 + $0x48] sm:$0xff] %v3212_v47 }
 0x2f4   : > { %3221 = vst [vmem:[%s4789_s26 + $0x40] sm:$0xff] %v3211_v48 }
 0x2f5 PF: > { %s17_s24 = sadd.s32 1, %s4191_s24  }
 0x2f6   : > { %p14_p4 = scmp.ge.s32.totalorder %s17_s24, 4  }
 0x2f8   :  { %16 = sbr.rel (!%p14_p4) target bundleno = 1 (0x1), region = 92 }

</bundles_post_ra>
